<compile_context>
chip_gen: v7x
topology: tpu7x:2x2x1
jax: 0.10.0
libtpu: 0.0.40
codegen_flags: <defaults>
</compile_context>

<pallas_src>
import functools

import jax
import jax.numpy as jnp
from jax import lax
from jax.experimental import pallas as pl
from jax.experimental.pallas import tpu as pltpu


def _sppf_kernel(x_ref, w1_ref, b1_ref, w2_ref, b2_ref, mask_ref, o_ref, *,
                 W, mxu_dtype):
    """One grid step: (C1, L) -> (C2, L) with L = bg * H * W lanes."""
    L = x_ref.shape[-1]

    # ---- cv1: 1x1 conv (+ folded BN) + SiLU (f32 accumulate / f32 act) -----
    h = jnp.dot(w1_ref[...], x_ref[...], preferred_element_type=jnp.float32)
    h = h + b1_ref[...]                                  # (C_, L) + (C_, 1)
    h = h * jax.nn.sigmoid(h)                            # SiLU -> finite

    def maxpool5(a):
        # Separable 5x5/s1/p2 max pool.  pltpu.roll rotates lanes circularly;
        # any tap that would cross a row edge / image border / batch boundary
        # is exactly a masked (-inf) position, so wrapped data never survives
        # the maximum.  mask_ref[i] is (1, L): sublane broadcast is free.
        r = a
        for i, d in enumerate((-2, -1, 1, 2)):           # 1x5 pass along W
            t = pltpu.roll(a, shift=(-d) % L, axis=1)
            r = jnp.maximum(r, t + mask_ref[i])
        o = r
        for i, d in enumerate((-2 * W, -W, W, 2 * W)):   # 5x1 pass along H
            t = pltpu.roll(r, shift=(-d) % L, axis=1)
            o = jnp.maximum(o, t + mask_ref[4 + i])
        return o

    def mm(i, a):
        # w2_ref is the stacked (4, C2, C_) cv2 weight; static leading index.
        return jnp.dot(w2_ref[i], a.astype(mxu_dtype),
                       preferred_element_type=jnp.float32)

    # ---- cv2 interleaved with the pool chain (no channel concat; at most two
    # activation slabs + one f32 accumulator live at any point) --------------
    acc = mm(0, h)
    y = maxpool5(h)
    acc = acc + mm(1, y)
    y = maxpool5(y)
    acc = acc + mm(2, y)
    y = maxpool5(y)
    acc = acc + mm(3, y)

    acc = acc + b2_ref[...]
    o_ref[...] = (acc * jax.nn.sigmoid(acc)).astype(o_ref.dtype)


def _pick_batch_group(B, C1, C_, C2, HW, mxu_bytes, budget_bytes):
    """Largest divisor bg of B whose per-step working set fits the budget and
    whose lane width keeps the (8,128) block constraint satisfied."""
    f32 = 4

    def est(bg):
        L = bg * HW
        return (2 * C1 * L * mxu_bytes          # double-buffered input slab
                + 2 * C2 * L * f32              # double-buffered output slab
                + 4 * C_ * L * f32              # live activation slabs + roll tmp
                + C2 * L * f32                  # cv2 accumulator
                + 2 * 8 * L * f32)              # -inf tap masks

    best = None
    for bg in range(1, B + 1):
        if B % bg:
            continue
        if bg != B and (bg * HW) % 128 != 0:    # partial fold must stay lane-aligned
            continue
        if est(bg) <= budget_bytes:
            best = bg
    if best is not None:
        return best
    for bg in range(1, B + 1):                  # smallest legal fold as fallback
        if B % bg == 0 and (bg == B or (bg * HW) % 128 == 0):
            return bg
    return B


@functools.partial(jax.jit, static_argnames=("mxu_dtype", "batch_group"))
def sppf_pallas(x_nchw, w1, b1, w2, b2, *, mxu_dtype=jnp.bfloat16,
                batch_group=None):
    """SPPF forward.  x_nchw: (B, C1, H, W); w1: (C_, C1); w2: (C2, 4*C_).

    w1/b1, w2/b2 are the 1x1 conv weights with eval-mode BatchNorm folded in
    (see make_sppf_params).  Returns (B, C2, H, W) float32.  MXU operands are
    bf16 by default (f32 accumulation, f32 pool/activation math); pass
    mxu_dtype=jnp.float32 for a bit-tight check.
    """
    B, C1, H, W = x_nchw.shape
    C_ = w1.shape[0]
    C2 = w2.shape[0]
    HW = H * W

    mxu_dtype = jnp.dtype(mxu_dtype)
    mxu_bytes = mxu_dtype.itemsize
    bg = batch_group if batch_group is not None else _pick_batch_group(
        B, C1, C_, C2, HW, mxu_bytes, budget_bytes=24 * 1024 * 1024)
    assert B % bg == 0
    L = bg * HW
    steps = B // bg

    # Channels-first with the batch folded onto the lane axis: (C1, B*H*W).
    x_fold = x_nchw.reshape(B, C1, HW).transpose(1, 0, 2).reshape(C1, B * HW)
    x_fold = x_fold.astype(mxu_dtype)

    w1c = w1.astype(mxu_dtype)
    # cv2 weight as one stacked (4, C2, C_) block: single DMA; block i
    # multiplies x / y1 / y2 / y3 respectively inside the kernel.
    w2s = w2.reshape(C2, 4, C_).transpose(1, 0, 2).astype(mxu_dtype)
    b1c = b1.reshape(C_, 1).astype(jnp.float32)
    b2c = b2.reshape(C2, 1).astype(jnp.float32)

    # Additive tap-validity masks (0 = valid, -inf = invalid), one row per tap
    # of the separable pool, tiled bg times along the lane axis so taps can
    # never leak across image / batch boundaries after the batch fold.
    pos = jnp.arange(HW, dtype=jnp.int32)
    w_pos = pos % W
    offs = (-2, -1, 1, 2)
    valid = [(w_pos + d >= 0) & (w_pos + d < W) for d in offs]        # W taps
    valid += [(pos + d * W >= 0) & (pos + d * W < HW) for d in offs]  # H taps
    masks = jnp.where(jnp.stack(valid), 0.0, -jnp.inf).astype(jnp.float32)
    masks = jnp.tile(masks.reshape(8, 1, HW), (1, 1, bg))

    # Explicit VMEM ceiling derived from the per-step working set (v7x has
    # 64 MiB physical / 32 MiB default scoped; v5e/v6e have 128 MiB).
    f32 = 4
    vmem_est = (2 * C1 * L * mxu_bytes + 2 * C2 * L * f32
                + 4 * C_ * L * f32 + C2 * L * f32 + 2 * 8 * L * f32
                + 2 * (C_ * C1 + 4 * C2 * C_) * mxu_bytes
                + 2 * (C_ + C2) * f32)
    vmem_limit = int(min(max(2 * vmem_est, 16 * 1024 * 1024),
                         64 * 1024 * 1024))

    kernel = functools.partial(_sppf_kernel, W=W, mxu_dtype=mxu_dtype)

    out = pl.pallas_call(
        kernel,
        out_shape=jax.ShapeDtypeStruct((C2, B * HW), jnp.float32),
        grid=(steps,),
        in_specs=[
            pl.BlockSpec((C1, L), lambda g: (0, g)),
            pl.BlockSpec((C_, C1), lambda g: (0, 0)),
            pl.BlockSpec((C_, 1), lambda g: (0, 0)),
            pl.BlockSpec((4, C2, C_), lambda g: (0, 0, 0)),
            pl.BlockSpec((C2, 1), lambda g: (0, 0)),
            pl.BlockSpec((8, 1, L), lambda g: (0, 0, 0)),
        ],
        out_specs=pl.BlockSpec((C2, L), lambda g: (0, g)),
        # Batch groups are independent: shard them across cores on v7x.
        compiler_params=pltpu.CompilerParams(
            dimension_semantics=("parallel",),
            vmem_limit_bytes=vmem_limit),
    )(x_fold, w1c, b1c, w2s, b2c, masks)

    # TODO(synk): for production SPPF shapes where H*W is not a multiple of
    # 128 (e.g. 40x40=1600), pad the folded lane axis to the next 128-multiple
    # (or add an H-tiled grid axis with a 6-row halo for the 3 chained pools)
    # so output stores stay unmasked lane-dense vst.
    return out.reshape(C2, B, HW).transpose(1, 0, 2).reshape(B, C2, H, W)


def _fold_bn(w_conv, gamma, beta, mean, var, eps=1e-3):
    """Fold eval-mode BatchNorm into a 1x1 conv. w_conv: (c_out, c_in)."""
    scale = gamma / jnp.sqrt(var + eps)          # eps=1e-3 matches Conv's BN
    w = w_conv * scale[:, None]
    b = beta - mean * scale
    return w.astype(jnp.float32), b.astype(jnp.float32)


def make_sppf_params(key, c1, c2):
    c_ = c1 // 2
    ks = jax.random.split(key, 10)
    # cv1: Conv2d(c1, c_, 1, bias=False) + BN(c_)
    w1_conv = 0.2 * jax.random.normal(ks[0], (c_, c1), jnp.float32)
    g1 = 1.0 + 0.1 * jax.random.normal(ks[1], (c_,), jnp.float32)
    beta1 = 0.1 * jax.random.normal(ks[2], (c_,), jnp.float32)
    mean1 = 0.1 * jax.random.normal(ks[3], (c_,), jnp.float32)
    var1 = jnp.abs(jax.random.normal(ks[4], (c_,), jnp.float32)) + 0.5
    # cv2: Conv2d(4*c_, c2, 1, bias=False) + BN(c2)
    w2_conv = 0.2 * jax.random.normal(ks[5], (c2, 4 * c_), jnp.float32)
    g2 = 1.0 + 0.1 * jax.random.normal(ks[6], (c2,), jnp.float32)
    beta2 = 0.1 * jax.random.normal(ks[7], (c2,), jnp.float32)
    mean2 = 0.1 * jax.random.normal(ks[8], (c2,), jnp.float32)
    var2 = jnp.abs(jax.random.normal(ks[9], (c2,), jnp.float32)) + 0.5

    w1, b1 = _fold_bn(w1_conv, g1, beta1, mean1, var1)
    w2, b2 = _fold_bn(w2_conv, g2, beta2, mean2, var2)
    return w1, b1, w2, b2


def sppf_reference(x_nchw, w1, b1, w2, b2):
    """Pure-JAX NCHW reference mirroring PyTorch SPPF.forward (BN folded)."""
    h = jnp.einsum('oc,bchw->bohw', w1, x_nchw) + b1[None, :, None, None]
    h = h * jax.nn.sigmoid(h)

    def mp(a):
        return lax.reduce_window(a, -jnp.inf, lax.max,
                                 window_dimensions=(1, 1, 5, 5),
                                 window_strides=(1, 1, 1, 1),
                                 padding=((0, 0), (0, 0), (2, 2), (2, 2)))

    y1 = mp(h)
    y2 = mp(y1)
    y3 = mp(y2)
    cat = jnp.concatenate([h, y1, y2, y3], axis=1)
    o = jnp.einsum('oc,bchw->bohw', w2, cat) + b2[None, :, None, None]
    return o * jax.nn.sigmoid(o)


if __name__ == "__main__":
    key = jax.random.PRNGKey(0)
    B, C1, H, W = 2, 8, 16, 16     # PyTorch SPPF(c1=8, c2=8) on (2, 8, 16, 16)
    C2 = 8

    k_x, k_p = jax.random.split(key)
    x = jax.random.normal(k_x, (B, C1, H, W), jnp.float32)
    w1, b1, w2, b2 = make_sppf_params(k_p, C1, C2)

    ref = sppf_reference(x, w1, b1, w2, b2)

    # f32-fed MXU path: tight structural / numerical check.
    out_f32 = jax.block_until_ready(
        sppf_pallas(x, w1, b1, w2, b2, mxu_dtype=jnp.float32))
    assert out_f32.shape == (B, C2, H, W), out_f32.shape
    assert jnp.allclose(out_f32, ref, atol=5e-4, rtol=5e-4), (
        float(jnp.max(jnp.abs(out_f32 - ref))))

    # Default bf16-fed MXU path (f32 accumulation / f32 pool math): only MXU
    # quantization error relative to the f32 reference; per-element rel check.
    out_bf16 = jax.block_until_ready(sppf_pallas(x, w1, b1, w2, b2))
    assert out_bf16.shape == (B, C2, H, W), out_bf16.shape
    ok = jnp.abs(out_bf16 - ref) <= 5e-2 + 5e-2 * jnp.abs(ref)
    assert bool(jnp.all(ok)), float(jnp.max(jnp.abs(out_bf16 - ref)))

    print("KERNEL_OK")
</pallas_src>

<mosaic_0001>
module attributes {stable_mosaic.version = 11 : i64} {
  func.func @_sppf_kernel(%arg0: i32, %arg1: memref<8x512xf32, #tpu.memory_space<vmem>>, %arg2: memref<4x8xf32, #tpu.memory_space<vmem>>, %arg3: memref<4x1xf32, #tpu.memory_space<vmem>>, %arg4: memref<4x8x4xf32, #tpu.memory_space<vmem>>, %arg5: memref<8x1xf32, #tpu.memory_space<vmem>>, %arg6: memref<8x1x512xf32, #tpu.memory_space<vmem>>, %arg7: memref<8x512xf32, #tpu.memory_space<vmem>>) attributes {dimension_semantics = [#tpu.dimension_semantics<parallel>], iteration_bounds = array<i64: 1>, scalar_prefetch = 0 : i64, scratch_operands = 0 : i64, tpu.core_type = #tpu.core_type<tc>, window_params = [{transform_indices = @transform_0, window_bounds = array<i64: 8, 512>}, {pipeline_mode = #tpu.pipeline_mode<synchronous>, transform_indices = @transform_1, window_bounds = array<i64: 4, 8>}, {pipeline_mode = #tpu.pipeline_mode<synchronous>, transform_indices = @transform_2, window_bounds = array<i64: 4, 1>}, {pipeline_mode = #tpu.pipeline_mode<synchronous>, transform_indices = @transform_3, window_bounds = array<i64: 4, 8, 4>}, {pipeline_mode = #tpu.pipeline_mode<synchronous>, transform_indices = @transform_4, window_bounds = array<i64: 8, 1>}, {pipeline_mode = #tpu.pipeline_mode<synchronous>, transform_indices = @transform_5, window_bounds = array<i64: 8, 1, 512>}, {transform_indices = @transform_6, window_bounds = array<i64: 8, 512>}]} {
    %c0 = arith.constant 0 : index
    %c0_0 = arith.constant 0 : index
    %0 = vector.load %arg2[%c0, %c0_0] : memref<4x8xf32, #tpu.memory_space<vmem>>, vector<4x8xf32>
    %c0_1 = arith.constant 0 : index
    %c0_2 = arith.constant 0 : index
    %1 = vector.load %arg1[%c0_1, %c0_2] : memref<8x512xf32, #tpu.memory_space<vmem>>, vector<8x512xf32>
    %cst = arith.constant dense<0.000000e+00> : vector<4x512xf32>
    %2 = tpu.matmul %0, %1, %cst {dimension_numbers = #tpu.dot_dimension_numbers<[1], [0], [0], [1], [0, 0, 1, 1], [], []>} : vector<4x8xf32>, vector<8x512xf32>, vector<4x512xf32> -> vector<4x512xf32>
    %c0_3 = arith.constant 0 : index
    %c0_4 = arith.constant 0 : index
    %3 = vector.load %arg3[%c0_3, %c0_4] : memref<4x1xf32, #tpu.memory_space<vmem>>, vector<4x1xf32>
    %4 = vector.broadcast %3 : vector<4x1xf32> to vector<4x512xf32>
    %5 = arith.addf %2, %4 : vector<4x512xf32>
    %6 = arith.negf %5 : vector<4x512xf32>
    %7 = math.exp %6 : vector<4x512xf32>
    %cst_5 = arith.constant 1.000000e+00 : f32
    %8 = vector.broadcast %cst_5 : f32 to vector<4x512xf32>
    %9 = arith.addf %8, %7 : vector<4x512xf32>
    %10 = arith.divf %8, %9 : vector<4x512xf32>
    %11 = arith.mulf %5, %10 : vector<4x512xf32>
    %c0_6 = arith.constant 0 : index
    %c0_7 = arith.constant 0 : index
    %c0_8 = arith.constant 0 : index
    %12 = vector.load %arg4[%c0_6, %c0_7, %c0_8] : memref<4x8x4xf32, #tpu.memory_space<vmem>>, vector<1x8x4xf32>
    %13 = vector.shape_cast %12 : vector<1x8x4xf32> to vector<8x4xf32>
    %cst_9 = arith.constant dense<0.000000e+00> : vector<8x512xf32>
    %14 = tpu.matmul %13, %11, %cst_9 {dimension_numbers = #tpu.dot_dimension_numbers<[1], [0], [0], [1], [0, 0, 1, 1], [], []>} : vector<8x4xf32>, vector<4x512xf32>, vector<8x512xf32> -> vector<8x512xf32>
    %c2_i32 = arith.constant 2 : i32
    %15 = tpu.dynamic_rotate %11 by %c2_i32 dim 1 : vector<4x512xf32>, i32 -> vector<4x512xf32>
    %c0_10 = arith.constant 0 : index
    %c0_11 = arith.constant 0 : index
    %c0_12 = arith.constant 0 : index
    %16 = vector.load %arg6[%c0_10, %c0_11, %c0_12] : memref<8x1x512xf32, #tpu.memory_space<vmem>>, vector<1x1x512xf32>
    %17 = vector.shape_cast %16 : vector<1x1x512xf32> to vector<1x512xf32>
    %18 = vector.broadcast %17 : vector<1x512xf32> to vector<4x512xf32>
    %19 = arith.addf %15, %18 : vector<4x512xf32>
    %20 = arith.maximumf %11, %19 : vector<4x512xf32>
    %c1_i32 = arith.constant 1 : i32
    %21 = tpu.dynamic_rotate %11 by %c1_i32 dim 1 : vector<4x512xf32>, i32 -> vector<4x512xf32>
    %c1 = arith.constant 1 : index
    %c0_13 = arith.constant 0 : index
    %c0_14 = arith.constant 0 : index
    %22 = vector.load %arg6[%c1, %c0_13, %c0_14] : memref<8x1x512xf32, #tpu.memory_space<vmem>>, vector<1x1x512xf32>
    %23 = vector.shape_cast %22 : vector<1x1x512xf32> to vector<1x512xf32>
    %24 = vector.broadcast %23 : vector<1x512xf32> to vector<4x512xf32>
    %25 = arith.addf %21, %24 : vector<4x512xf32>
    %26 = arith.maximumf %20, %25 : vector<4x512xf32>
    %c511_i32 = arith.constant 511 : i32
    %27 = tpu.dynamic_rotate %11 by %c511_i32 dim 1 : vector<4x512xf32>, i32 -> vector<4x512xf32>
    %c2 = arith.constant 2 : index
    %c0_15 = arith.constant 0 : index
    %c0_16 = arith.constant 0 : index
    %28 = vector.load %arg6[%c2, %c0_15, %c0_16] : memref<8x1x512xf32, #tpu.memory_space<vmem>>, vector<1x1x512xf32>
    %29 = vector.shape_cast %28 : vector<1x1x512xf32> to vector<1x512xf32>
    %30 = vector.broadcast %29 : vector<1x512xf32> to vector<4x512xf32>
    %31 = arith.addf %27, %30 : vector<4x512xf32>
    %32 = arith.maximumf %26, %31 : vector<4x512xf32>
    %c510_i32 = arith.constant 510 : i32
    %33 = tpu.dynamic_rotate %11 by %c510_i32 dim 1 : vector<4x512xf32>, i32 -> vector<4x512xf32>
    %c3 = arith.constant 3 : index
    %c0_17 = arith.constant 0 : index
    %c0_18 = arith.constant 0 : index
    %34 = vector.load %arg6[%c3, %c0_17, %c0_18] : memref<8x1x512xf32, #tpu.memory_space<vmem>>, vector<1x1x512xf32>
    %35 = vector.shape_cast %34 : vector<1x1x512xf32> to vector<1x512xf32>
    %36 = vector.broadcast %35 : vector<1x512xf32> to vector<4x512xf32>
    %37 = arith.addf %33, %36 : vector<4x512xf32>
    %38 = arith.maximumf %32, %37 : vector<4x512xf32>
    %c32_i32 = arith.constant 32 : i32
    %39 = tpu.dynamic_rotate %38 by %c32_i32 dim 1 : vector<4x512xf32>, i32 -> vector<4x512xf32>
    %c4 = arith.constant 4 : index
    %c0_19 = arith.constant 0 : index
    %c0_20 = arith.constant 0 : index
    %40 = vector.load %arg6[%c4, %c0_19, %c0_20] : memref<8x1x512xf32, #tpu.memory_space<vmem>>, vector<1x1x512xf32>
    %41 = vector.shape_cast %40 : vector<1x1x512xf32> to vector<1x512xf32>
    %42 = vector.broadcast %41 : vector<1x512xf32> to vector<4x512xf32>
    %43 = arith.addf %39, %42 : vector<4x512xf32>
    %44 = arith.maximumf %38, %43 : vector<4x512xf32>
    %c16_i32 = arith.constant 16 : i32
    %45 = tpu.dynamic_rotate %38 by %c16_i32 dim 1 : vector<4x512xf32>, i32 -> vector<4x512xf32>
    %c5 = arith.constant 5 : index
    %c0_21 = arith.constant 0 : index
    %c0_22 = arith.constant 0 : index
    %46 = vector.load %arg6[%c5, %c0_21, %c0_22] : memref<8x1x512xf32, #tpu.memory_space<vmem>>, vector<1x1x512xf32>
    %47 = vector.shape_cast %46 : vector<1x1x512xf32> to vector<1x512xf32>
    %48 = vector.broadcast %47 : vector<1x512xf32> to vector<4x512xf32>
    %49 = arith.addf %45, %48 : vector<4x512xf32>
    %50 = arith.maximumf %44, %49 : vector<4x512xf32>
    %c496_i32 = arith.constant 496 : i32
    %51 = tpu.dynamic_rotate %38 by %c496_i32 dim 1 : vector<4x512xf32>, i32 -> vector<4x512xf32>
    %c6 = arith.constant 6 : index
    %c0_23 = arith.constant 0 : index
    %c0_24 = arith.constant 0 : index
    %52 = vector.load %arg6[%c6, %c0_23, %c0_24] : memref<8x1x512xf32, #tpu.memory_space<vmem>>, vector<1x1x512xf32>
    %53 = vector.shape_cast %52 : vector<1x1x512xf32> to vector<1x512xf32>
    %54 = vector.broadcast %53 : vector<1x512xf32> to vector<4x512xf32>
    %55 = arith.addf %51, %54 : vector<4x512xf32>
    %56 = arith.maximumf %50, %55 : vector<4x512xf32>
    %c480_i32 = arith.constant 480 : i32
    %57 = tpu.dynamic_rotate %38 by %c480_i32 dim 1 : vector<4x512xf32>, i32 -> vector<4x512xf32>
    %c7 = arith.constant 7 : index
    %c0_25 = arith.constant 0 : index
    %c0_26 = arith.constant 0 : index
    %58 = vector.load %arg6[%c7, %c0_25, %c0_26] : memref<8x1x512xf32, #tpu.memory_space<vmem>>, vector<1x1x512xf32>
    %59 = vector.shape_cast %58 : vector<1x1x512xf32> to vector<1x512xf32>
    %60 = vector.broadcast %59 : vector<1x512xf32> to vector<4x512xf32>
    %61 = arith.addf %57, %60 : vector<4x512xf32>
    %62 = arith.maximumf %56, %61 : vector<4x512xf32>
    %c1_27 = arith.constant 1 : index
    %c0_28 = arith.constant 0 : index
    %c0_29 = arith.constant 0 : index
    %63 = vector.load %arg4[%c1_27, %c0_28, %c0_29] : memref<4x8x4xf32, #tpu.memory_space<vmem>>, vector<1x8x4xf32>
    %64 = vector.shape_cast %63 : vector<1x8x4xf32> to vector<8x4xf32>
    %cst_30 = arith.constant dense<0.000000e+00> : vector<8x512xf32>
    %65 = tpu.matmul %64, %62, %cst_30 {dimension_numbers = #tpu.dot_dimension_numbers<[1], [0], [0], [1], [0, 0, 1, 1], [], []>} : vector<8x4xf32>, vector<4x512xf32>, vector<8x512xf32> -> vector<8x512xf32>
    %66 = arith.addf %14, %65 : vector<8x512xf32>
    %c2_i32_31 = arith.constant 2 : i32
    %67 = tpu.dynamic_rotate %62 by %c2_i32_31 dim 1 : vector<4x512xf32>, i32 -> vector<4x512xf32>
    %c0_32 = arith.constant 0 : index
    %c0_33 = arith.constant 0 : index
    %c0_34 = arith.constant 0 : index
    %68 = vector.load %arg6[%c0_32, %c0_33, %c0_34] : memref<8x1x512xf32, #tpu.memory_space<vmem>>, vector<1x1x512xf32>
    %69 = vector.shape_cast %68 : vector<1x1x512xf32> to vector<1x512xf32>
    %70 = vector.broadcast %69 : vector<1x512xf32> to vector<4x512xf32>
    %71 = arith.addf %67, %70 : vector<4x512xf32>
    %72 = arith.maximumf %62, %71 : vector<4x512xf32>
    %c1_i32_35 = arith.constant 1 : i32
    %73 = tpu.dynamic_rotate %62 by %c1_i32_35 dim 1 : vector<4x512xf32>, i32 -> vector<4x512xf32>
    %c1_36 = arith.constant 1 : index
    %c0_37 = arith.constant 0 : index
    %c0_38 = arith.constant 0 : index
    %74 = vector.load %arg6[%c1_36, %c0_37, %c0_38] : memref<8x1x512xf32, #tpu.memory_space<vmem>>, vector<1x1x512xf32>
    %75 = vector.shape_cast %74 : vector<1x1x512xf32> to vector<1x512xf32>
    %76 = vector.broadcast %75 : vector<1x512xf32> to vector<4x512xf32>
    %77 = arith.addf %73, %76 : vector<4x512xf32>
    %78 = arith.maximumf %72, %77 : vector<4x512xf32>
    %c511_i32_39 = arith.constant 511 : i32
    %79 = tpu.dynamic_rotate %62 by %c511_i32_39 dim 1 : vector<4x512xf32>, i32 -> vector<4x512xf32>
    %c2_40 = arith.constant 2 : index
    %c0_41 = arith.constant 0 : index
    %c0_42 = arith.constant 0 : index
    %80 = vector.load %arg6[%c2_40, %c0_41, %c0_42] : memref<8x1x512xf32, #tpu.memory_space<vmem>>, vector<1x1x512xf32>
    %81 = vector.shape_cast %80 : vector<1x1x512xf32> to vector<1x512xf32>
    %82 = vector.broadcast %81 : vector<1x512xf32> to vector<4x512xf32>
    %83 = arith.addf %79, %82 : vector<4x512xf32>
    %84 = arith.maximumf %78, %83 : vector<4x512xf32>
    %c510_i32_43 = arith.constant 510 : i32
    %85 = tpu.dynamic_rotate %62 by %c510_i32_43 dim 1 : vector<4x512xf32>, i32 -> vector<4x512xf32>
    %c3_44 = arith.constant 3 : index
    %c0_45 = arith.constant 0 : index
    %c0_46 = arith.constant 0 : index
    %86 = vector.load %arg6[%c3_44, %c0_45, %c0_46] : memref<8x1x512xf32, #tpu.memory_space<vmem>>, vector<1x1x512xf32>
    %87 = vector.shape_cast %86 : vector<1x1x512xf32> to vector<1x512xf32>
    %88 = vector.broadcast %87 : vector<1x512xf32> to vector<4x512xf32>
    %89 = arith.addf %85, %88 : vector<4x512xf32>
    %90 = arith.maximumf %84, %89 : vector<4x512xf32>
    %c32_i32_47 = arith.constant 32 : i32
    %91 = tpu.dynamic_rotate %90 by %c32_i32_47 dim 1 : vector<4x512xf32>, i32 -> vector<4x512xf32>
    %c4_48 = arith.constant 4 : index
    %c0_49 = arith.constant 0 : index
    %c0_50 = arith.constant 0 : index
    %92 = vector.load %arg6[%c4_48, %c0_49, %c0_50] : memref<8x1x512xf32, #tpu.memory_space<vmem>>, vector<1x1x512xf32>
    %93 = vector.shape_cast %92 : vector<1x1x512xf32> to vector<1x512xf32>
    %94 = vector.broadcast %93 : vector<1x512xf32> to vector<4x512xf32>
    %95 = arith.addf %91, %94 : vector<4x512xf32>
    %96 = arith.maximumf %90, %95 : vector<4x512xf32>
    %c16_i32_51 = arith.constant 16 : i32
    %97 = tpu.dynamic_rotate %90 by %c16_i32_51 dim 1 : vector<4x512xf32>, i32 -> vector<4x512xf32>
    %c5_52 = arith.constant 5 : index
    %c0_53 = arith.constant 0 : index
    %c0_54 = arith.constant 0 : index
    %98 = vector.load %arg6[%c5_52, %c0_53, %c0_54] : memref<8x1x512xf32, #tpu.memory_space<vmem>>, vector<1x1x512xf32>
    %99 = vector.shape_cast %98 : vector<1x1x512xf32> to vector<1x512xf32>
    %100 = vector.broadcast %99 : vector<1x512xf32> to vector<4x512xf32>
    %101 = arith.addf %97, %100 : vector<4x512xf32>
    %102 = arith.maximumf %96, %101 : vector<4x512xf32>
    %c496_i32_55 = arith.constant 496 : i32
    %103 = tpu.dynamic_rotate %90 by %c496_i32_55 dim 1 : vector<4x512xf32>, i32 -> vector<4x512xf32>
    %c6_56 = arith.constant 6 : index
    %c0_57 = arith.constant 0 : index
    %c0_58 = arith.constant 0 : index
    %104 = vector.load %arg6[%c6_56, %c0_57, %c0_58] : memref<8x1x512xf32, #tpu.memory_space<vmem>>, vector<1x1x512xf32>
    %105 = vector.shape_cast %104 : vector<1x1x512xf32> to vector<1x512xf32>
    %106 = vector.broadcast %105 : vector<1x512xf32> to vector<4x512xf32>
    %107 = arith.addf %103, %106 : vector<4x512xf32>
    %108 = arith.maximumf %102, %107 : vector<4x512xf32>
    %c480_i32_59 = arith.constant 480 : i32
    %109 = tpu.dynamic_rotate %90 by %c480_i32_59 dim 1 : vector<4x512xf32>, i32 -> vector<4x512xf32>
    %c7_60 = arith.constant 7 : index
    %c0_61 = arith.constant 0 : index
    %c0_62 = arith.constant 0 : index
    %110 = vector.load %arg6[%c7_60, %c0_61, %c0_62] : memref<8x1x512xf32, #tpu.memory_space<vmem>>, vector<1x1x512xf32>
    %111 = vector.shape_cast %110 : vector<1x1x512xf32> to vector<1x512xf32>
    %112 = vector.broadcast %111 : vector<1x512xf32> to vector<4x512xf32>
    %113 = arith.addf %109, %112 : vector<4x512xf32>
    %114 = arith.maximumf %108, %113 : vector<4x512xf32>
    %c2_63 = arith.constant 2 : index
    %c0_64 = arith.constant 0 : index
    %c0_65 = arith.constant 0 : index
    %115 = vector.load %arg4[%c2_63, %c0_64, %c0_65] : memref<4x8x4xf32, #tpu.memory_space<vmem>>, vector<1x8x4xf32>
    %116 = vector.shape_cast %115 : vector<1x8x4xf32> to vector<8x4xf32>
    %cst_66 = arith.constant dense<0.000000e+00> : vector<8x512xf32>
    %117 = tpu.matmul %116, %114, %cst_66 {dimension_numbers = #tpu.dot_dimension_numbers<[1], [0], [0], [1], [0, 0, 1, 1], [], []>} : vector<8x4xf32>, vector<4x512xf32>, vector<8x512xf32> -> vector<8x512xf32>
    %118 = arith.addf %66, %117 : vector<8x512xf32>
    %c2_i32_67 = arith.constant 2 : i32
    %119 = tpu.dynamic_rotate %114 by %c2_i32_67 dim 1 : vector<4x512xf32>, i32 -> vector<4x512xf32>
    %c0_68 = arith.constant 0 : index
    %c0_69 = arith.constant 0 : index
    %c0_70 = arith.constant 0 : index
    %120 = vector.load %arg6[%c0_68, %c0_69, %c0_70] : memref<8x1x512xf32, #tpu.memory_space<vmem>>, vector<1x1x512xf32>
    %121 = vector.shape_cast %120 : vector<1x1x512xf32> to vector<1x512xf32>
    %122 = vector.broadcast %121 : vector<1x512xf32> to vector<4x512xf32>
    %123 = arith.addf %119, %122 : vector<4x512xf32>
    %124 = arith.maximumf %114, %123 : vector<4x512xf32>
    %c1_i32_71 = arith.constant 1 : i32
    %125 = tpu.dynamic_rotate %114 by %c1_i32_71 dim 1 : vector<4x512xf32>, i32 -> vector<4x512xf32>
    %c1_72 = arith.constant 1 : index
    %c0_73 = arith.constant 0 : index
    %c0_74 = arith.constant 0 : index
    %126 = vector.load %arg6[%c1_72, %c0_73, %c0_74] : memref<8x1x512xf32, #tpu.memory_space<vmem>>, vector<1x1x512xf32>
    %127 = vector.shape_cast %126 : vector<1x1x512xf32> to vector<1x512xf32>
    %128 = vector.broadcast %127 : vector<1x512xf32> to vector<4x512xf32>
    %129 = arith.addf %125, %128 : vector<4x512xf32>
    %130 = arith.maximumf %124, %129 : vector<4x512xf32>
    %c511_i32_75 = arith.constant 511 : i32
    %131 = tpu.dynamic_rotate %114 by %c511_i32_75 dim 1 : vector<4x512xf32>, i32 -> vector<4x512xf32>
    %c2_76 = arith.constant 2 : index
    %c0_77 = arith.constant 0 : index
    %c0_78 = arith.constant 0 : index
    %132 = vector.load %arg6[%c2_76, %c0_77, %c0_78] : memref<8x1x512xf32, #tpu.memory_space<vmem>>, vector<1x1x512xf32>
    %133 = vector.shape_cast %132 : vector<1x1x512xf32> to vector<1x512xf32>
    %134 = vector.broadcast %133 : vector<1x512xf32> to vector<4x512xf32>
    %135 = arith.addf %131, %134 : vector<4x512xf32>
    %136 = arith.maximumf %130, %135 : vector<4x512xf32>
    %c510_i32_79 = arith.constant 510 : i32
    %137 = tpu.dynamic_rotate %114 by %c510_i32_79 dim 1 : vector<4x512xf32>, i32 -> vector<4x512xf32>
    %c3_80 = arith.constant 3 : index
    %c0_81 = arith.constant 0 : index
    %c0_82 = arith.constant 0 : index
    %138 = vector.load %arg6[%c3_80, %c0_81, %c0_82] : memref<8x1x512xf32, #tpu.memory_space<vmem>>, vector<1x1x512xf32>
    %139 = vector.shape_cast %138 : vector<1x1x512xf32> to vector<1x512xf32>
    %140 = vector.broadcast %139 : vector<1x512xf32> to vector<4x512xf32>
    %141 = arith.addf %137, %140 : vector<4x512xf32>
    %142 = arith.maximumf %136, %141 : vector<4x512xf32>
    %c32_i32_83 = arith.constant 32 : i32
    %143 = tpu.dynamic_rotate %142 by %c32_i32_83 dim 1 : vector<4x512xf32>, i32 -> vector<4x512xf32>
    %c4_84 = arith.constant 4 : index
    %c0_85 = arith.constant 0 : index
    %c0_86 = arith.constant 0 : index
    %144 = vector.load %arg6[%c4_84, %c0_85, %c0_86] : memref<8x1x512xf32, #tpu.memory_space<vmem>>, vector<1x1x512xf32>
    %145 = vector.shape_cast %144 : vector<1x1x512xf32> to vector<1x512xf32>
    %146 = vector.broadcast %145 : vector<1x512xf32> to vector<4x512xf32>
    %147 = arith.addf %143, %146 : vector<4x512xf32>
    %148 = arith.maximumf %142, %147 : vector<4x512xf32>
    %c16_i32_87 = arith.constant 16 : i32
    %149 = tpu.dynamic_rotate %142 by %c16_i32_87 dim 1 : vector<4x512xf32>, i32 -> vector<4x512xf32>
    %c5_88 = arith.constant 5 : index
    %c0_89 = arith.constant 0 : index
    %c0_90 = arith.constant 0 : index
    %150 = vector.load %arg6[%c5_88, %c0_89, %c0_90] : memref<8x1x512xf32, #tpu.memory_space<vmem>>, vector<1x1x512xf32>
    %151 = vector.shape_cast %150 : vector<1x1x512xf32> to vector<1x512xf32>
    %152 = vector.broadcast %151 : vector<1x512xf32> to vector<4x512xf32>
    %153 = arith.addf %149, %152 : vector<4x512xf32>
    %154 = arith.maximumf %148, %153 : vector<4x512xf32>
    %c496_i32_91 = arith.constant 496 : i32
    %155 = tpu.dynamic_rotate %142 by %c496_i32_91 dim 1 : vector<4x512xf32>, i32 -> vector<4x512xf32>
    %c6_92 = arith.constant 6 : index
    %c0_93 = arith.constant 0 : index
    %c0_94 = arith.constant 0 : index
    %156 = vector.load %arg6[%c6_92, %c0_93, %c0_94] : memref<8x1x512xf32, #tpu.memory_space<vmem>>, vector<1x1x512xf32>
    %157 = vector.shape_cast %156 : vector<1x1x512xf32> to vector<1x512xf32>
    %158 = vector.broadcast %157 : vector<1x512xf32> to vector<4x512xf32>
    %159 = arith.addf %155, %158 : vector<4x512xf32>
    %160 = arith.maximumf %154, %159 : vector<4x512xf32>
    %c480_i32_95 = arith.constant 480 : i32
    %161 = tpu.dynamic_rotate %142 by %c480_i32_95 dim 1 : vector<4x512xf32>, i32 -> vector<4x512xf32>
    %c7_96 = arith.constant 7 : index
    %c0_97 = arith.constant 0 : index
    %c0_98 = arith.constant 0 : index
    %162 = vector.load %arg6[%c7_96, %c0_97, %c0_98] : memref<8x1x512xf32, #tpu.memory_space<vmem>>, vector<1x1x512xf32>
    %163 = vector.shape_cast %162 : vector<1x1x512xf32> to vector<1x512xf32>
    %164 = vector.broadcast %163 : vector<1x512xf32> to vector<4x512xf32>
    %165 = arith.addf %161, %164 : vector<4x512xf32>
    %166 = arith.maximumf %160, %165 : vector<4x512xf32>
    %c3_99 = arith.constant 3 : index
    %c0_100 = arith.constant 0 : index
    %c0_101 = arith.constant 0 : index
    %167 = vector.load %arg4[%c3_99, %c0_100, %c0_101] : memref<4x8x4xf32, #tpu.memory_space<vmem>>, vector<1x8x4xf32>
    %168 = vector.shape_cast %167 : vector<1x8x4xf32> to vector<8x4xf32>
    %cst_102 = arith.constant dense<0.000000e+00> : vector<8x512xf32>
    %169 = tpu.matmul %168, %166, %cst_102 {dimension_numbers = #tpu.dot_dimension_numbers<[1], [0], [0], [1], [0, 0, 1, 1], [], []>} : vector<8x4xf32>, vector<4x512xf32>, vector<8x512xf32> -> vector<8x512xf32>
    %170 = arith.addf %118, %169 : vector<8x512xf32>
    %c0_103 = arith.constant 0 : index
    %c0_104 = arith.constant 0 : index
    %171 = vector.load %arg5[%c0_103, %c0_104] : memref<8x1xf32, #tpu.memory_space<vmem>>, vector<8x1xf32>
    %172 = vector.broadcast %171 : vector<8x1xf32> to vector<8x512xf32>
    %173 = arith.addf %170, %172 : vector<8x512xf32>
    %174 = arith.negf %173 : vector<8x512xf32>
    %175 = math.exp %174 : vector<8x512xf32>
    %cst_105 = arith.constant 1.000000e+00 : f32
    %176 = vector.broadcast %cst_105 : f32 to vector<8x512xf32>
    %177 = arith.addf %176, %175 : vector<8x512xf32>
    %178 = arith.divf %176, %177 : vector<8x512xf32>
    %179 = arith.mulf %173, %178 : vector<8x512xf32>
    %c0_106 = arith.constant 0 : index
    %c0_107 = arith.constant 0 : index
    %180 = vector.load %arg7[%c0_106, %c0_107] : memref<8x512xf32, #tpu.memory_space<vmem>>, vector<8x512xf32>
    tpu.vector_store %arg7[%c0_106, %c0_107], %179 {strides = array<i32>} : memref<8x512xf32, #tpu.memory_space<vmem>>, vector<8x512xf32>,
    return
  }
  func.func @transform_0(%arg0: i32) -> (i32, i32) {
    %c0_i32 = arith.constant 0 : i32
    %c0_i32_0 = arith.constant 0 : i32
    return %c0_i32, %arg0 : i32, i32
  }
  func.func @transform_1(%arg0: i32) -> (i32, i32) {
    %c0_i32 = arith.constant 0 : i32
    %c0_i32_0 = arith.constant 0 : i32
    %c0_i32_1 = arith.constant 0 : i32
    return %c0_i32, %c0_i32_0 : i32, i32
  }
  func.func @transform_2(%arg0: i32) -> (i32, i32) {
    %c0_i32 = arith.constant 0 : i32
    %c0_i32_0 = arith.constant 0 : i32
    %c0_i32_1 = arith.constant 0 : i32
    return %c0_i32, %c0_i32_0 : i32, i32
  }
  func.func @transform_3(%arg0: i32) -> (i32, i32, i32) {
    %c0_i32 = arith.constant 0 : i32
    %c0_i32_0 = arith.constant 0 : i32
    %c0_i32_1 = arith.constant 0 : i32
    %c0_i32_2 = arith.constant 0 : i32
    return %c0_i32, %c0_i32_0, %c0_i32_1 : i32, i32, i32
  }
  func.func @transform_4(%arg0: i32) -> (i32, i32) {
    %c0_i32 = arith.constant 0 : i32
    %c0_i32_0 = arith.constant 0 : i32
    %c0_i32_1 = arith.constant 0 : i32
    return %c0_i32, %c0_i32_0 : i32, i32
  }
  func.func @transform_5(%arg0: i32) -> (i32, i32, i32) {
    %c0_i32 = arith.constant 0 : i32
    %c0_i32_0 = arith.constant 0 : i32
    %c0_i32_1 = arith.constant 0 : i32
    %c0_i32_2 = arith.constant 0 : i32
    return %c0_i32, %c0_i32_0, %c0_i32_1 : i32, i32, i32
  }
  func.func @transform_6(%arg0: i32) -> (i32, i32) {
    %c0_i32 = arith.constant 0 : i32
    %c0_i32_0 = arith.constant 0 : i32
    return %c0_i32, %arg0 : i32, i32
  }
}

</mosaic_0001>

<bundles_post_ra>
// kernel: sppf_pallas.1
= control target key start
LH: loop header
LB: loop body
LE: loop exit
PB: predicated region body
PF: predicated region fallthrough
CT: control target
= control target key end

     0   :  { %v2490_v3 = vmov 0.0   ;;  %vm34_vm0 = vcmask 64512   ;;  %v1673_v7 = vmov 0   ;;  %s1677_s9 = smov 126   ;;  %v217_v39 = vlaneseq  ;;  %s1678_s18 = smov 32   ;;  %s2483_s0 = inlined_call_operand.vmem [shape: f32[8,512], index: 0, kind: input, shape index: {}]   ;;  %s2484_s1 = inlined_call_operand.vmem [shape: f32[4,8], index: 1, kind: input, shape index: {}]   ;;  %s2485_s2 = inlined_call_operand.vmem [shape: f32[4,1], index: 2, kind: input, shape index: {}]   ;;  %s2486_s5 = inlined_call_operand.vmem [shape: f32[8,1,512], index: 5, kind: input, shape index: {}]   ;;  %s2487_s3 = inlined_call_operand.vmem [shape: f32[4,8,4], index: 3, kind: input, shape index: {}]   ;;  %s2488_s4 = inlined_call_operand.vmem [shape: f32[8,1], index: 4, kind: input, shape index: {}]   ;;  %s2489_s6 = inlined_call_operand.vmem [shape: f32[8,512], index: 6, kind: output, shape index: {}]  }
   0x1   :  { %v25_v0 = vld [vmem:[%s2483_s0 + $0x8] sm:$0xff]  ;;  %v27_v1 = vld [vmem:[%s2483_s0 + $0x18] sm:$0xff]  ;;  %v24_v2 = vld [vmem:[%s2483_s0] sm:$0xff]  ;;  %102 = vmatprep.mubr.f32.mxu0 %v2490_v3  ;;  %173 = vmatprep.mubr.f32.mxu1 %v2490_v3  ;;  %s1679_s19 = smov 16   ;;  %s1680_s20 = smov 112   ;;  %vm568_vm9 = vcmask 1043456  }
   0x2   :  { %38 = vmatprep.subr.mxu0 %v25_v0  ;;  %109 = vmatprep.subr.mxu1 %v27_v1  ;;  %v26_v4 = vld [vmem:[%s2483_s0 + $0x10] sm:$0xff]  ;;  %v23_v5 = vld [vmem:[%s2484_s1] sm:$0xf]  ;;  %s1674_s0 = smov 2   ;;  %s1675_s1 = smov 1   ;;  %v227_v42 = vshrl.u32 %v217_v39, 7 }
   0x3   :  { %39 = vmatpush1.msra.mxu0 %v24_v2  ;;  %110 = vmatpush1.msra.mxu1 %v26_v4  ;;  %v28_v6 = vld [vmem:[%s2485_s2] sm:$0xf]  ;;  %s1676_s2 = smov 127   ;;  %v1779_v43 = vand.u32 127, %v217_v39  ;;  %v1578_v55 = vld [vmem:[%s2486_s5 + $0x4] sm:$0xf] }
   0x4   :  { %1572 = vmatmul.mubr.msk.f32.vlgmr.msra.gmra.mrb[0].mxu0 %vm34_vm0, %v23_v5  ;;  %1573 = vmatmul.mubr.msk.f32.vlgmr.msra.gmra.mrb[0].mxu1 %vm34_vm0, %v23_v5  ;;  %v1781_v45 = vsub.s32 0, %v227_v42  ;;  %v224_v47 = vld [vmem:[%s2486_s5] sm:$0xf]  ;;  %v1790_v51 = vsub.s32 3, %v227_v42  ;;  %v1794_v53 = vsub.s32 1, %v227_v42  ;;  %v1796_v54 = vsub.s32 2, %v227_v42 }
   0x5   :  { %1638 = vset.pattern.permute.xlu0 %v1673_v7  ;;  %645 = vmatprep.mubr.f32.mxu0 %v2490_v3  ;;  %vm219_vm1 = vcmp.lt.s32.totalorder %v1779_v43, 2  ;;  %v1579_v56 = vld [vmem:[%s2486_s5 + $0x8] sm:$0xf]  ;;  %vm262_vm2 = vcmp.lt.s32.totalorder %v1779_v43, 1  ;;  %vm306_vm3 = vcmp.lt.s32.totalorder %v1779_v43, 127  ;;  %vm350_vm4 = vcmp.lt.s32.totalorder %v1779_v43, 126 }
   0x6   :  { %31 = vperm.xlu0 %1638, %v28_v6   ;;  %716 = vmatprep.mubr.f32.mxu1 %v2490_v3  ;;  %v1788_v49 = vrot.slane %v224_v47, %v1781_v45  ;;  %v1806_v57 = vrot.slane %v1578_v55, %v1781_v45  ;;  %v1813_v62 = vrot.slane %v224_v47, %v1790_v51  ;;  %s1681_s21 = smov 96   ;;  %vm394_vm5 = vcmp.lt.s32.totalorder %v1779_v43, 32 }
   0x7   :  { %1639 = vset.pattern.permute.xlu1 %v1673_v7  ;;  %v1816_v63 = vrot.slane %v1578_v55, %v1794_v53  ;;  %v1819_v0 = vrot.slane %v1578_v55, %v1796_v54  ;;  %v1822_v1 = vrot.slane %v1579_v56, %v1781_v45  ;;  %v1825_v2 = vrot.slane %v1578_v55, %v1790_v51 }
   0x8   :  { %v1830_v5 = vrot.slane %v224_v47, %v1794_v53  ;;  %v1833_v6 = vrot.slane %v224_v47, %v1796_v54  ;;  %vm438_vm6 = vcmp.lt.s32.totalorder %v1779_v43, 16  ;;  %vm482_vm7 = vcmp.lt.s32.totalorder %v1779_v43, 112 }
   0x9   :  { %vm526_vm8 = vcmp.lt.s32.totalorder %v1779_v43, 96  ;;  %vm564_vm10 = vcmask 31744  }
  0x85   :  { %v32_v8 = vpop.permute.xlu0 %31 }
  0xd7   :  { %v104_v9 = vpop.f32.mrb[0].mxu0  ;;  %v175_v10 = vpop.f32.mrb[0].mxu1 }
  0xd8   :  { %v105_v11 = vadd.f32 %v104_v9, %v32_v8  ;;  %v176_v12 = vadd.f32 %v175_v10, %v32_v8  ;;  %v106_v13 = vpop.f32.mrb[1].mxu0  ;;  %v177_v14 = vpop.f32.mrb[1].mxu1  ;;  %v1840_v9 = vrot.slane %v1579_v56, %v1796_v54  ;;  %v1843_v10 = vrot.slane %v1579_v56, %v1790_v51 }
  0xd9   :  { %v107_v15 = vadd.f32 %v106_v13, %v32_v8  ;;  %v178_v16 = vadd.f32 %v177_v14, %v32_v8  ;;  %v1837_v8 = vrot.slane %v1579_v56, %v1794_v53 }
  0xda   :  { %v1574_v17 = vmul.f32 -1.442695, %v105_v11  ;;  %v1576_v18 = vmul.f32 -1.442695, %v176_v12 }
  0xdb   :  { %v1575_v19 = vmul.f32 -1.442695, %v107_v15  ;;  %v1577_v20 = vmul.f32 -1.442695, %v178_v16 }
  0xdc   :  { %1640 = vpow2.f32 %v1574_v17 }
  0xdd   :  { %1642 = vpow2.f32 %v1576_v18 }
  0xde   :  { %1644 = vpow2.f32 %v1575_v19 }
  0xdf   :  { %1646 = vpow2.f32 %v1577_v20 }
  0xe6   :  { %v1641_v21 = vpop.eup %1640 }
  0xe7   :  { %v1643_v22 = vpop.eup %1642  ;;  %v192_v23 = vadd.f32 1.0, %v1641_v21 }
  0xe8   :  { %v1645_v24 = vpop.eup %1644  ;;  %v194_v25 = vadd.f32 1.0, %v1643_v22 }
  0xe9   :  { %v1647_v26 = vpop.eup %1646  ;;  %1648 = vrcp.f32 %v192_v23  ;;  %v193_v28 = vadd.f32 1.0, %v1645_v24 }
  0xea   :  { %1650 = vrcp.f32 %v194_v25  ;;  %v195_v27 = vadd.f32 1.0, %v1647_v26 }
  0xec   :  { %1652 = vrcp.f32 %v195_v27 }
  0xed   :  { %1654 = vrcp.f32 %v193_v28 }
  0xf3   :  { %v1649_v29 = vpop.eup %1648 }
  0xf4   :  { %v1651_v30 = vpop.eup %1650  ;;  %v1739_v31 = vmul.f32 %v1649_v29, %v105_v11 }
  0xf5   :  { %v1741_v32 = vmul.f32 %v1651_v30, %v176_v12  ;;  %v1580_v12 = vld [vmem:[%s2486_s5 + $0xc] sm:$0xf] }
  0xf6   :  { %v1653_v33 = vpop.eup %1652  ;;  %209 = vrot.lane.b32.xlu0 %v1739_v31, %s1674_s0  ;;  %v1864_v23 = vrot.slane %v1580_v12, %v1781_v45  ;;  %v1867_v24 = vrot.slane %v1580_v12, %v1794_v53  ;;  %v1872_v29 = vrot.slane %v1580_v12, %v1796_v54  ;;  %v1890_v55 = vrot.slane %v1580_v12, %v1790_v51 }
  0xf7   :  { %213 = vrot.lane.b32.xlu1 %v1741_v32, %s1674_s0  ;;  %v1747_v34 = vmul.f32 %v1653_v33, %v178_v16  ;;  %v1655_v35 = vpop.eup %1654 }
  0xf8   :  { %v1753_v36 = vmul.f32 %v1655_v35, %v107_v15 }
  0xfa   :  { %215 = vrot.lane.b32.xlu0 %v1747_v34, %s1674_s0 }
  0xfb   :  { %254 = vrot.lane.b32.xlu1 %v1739_v31, %s1675_s1 }
  0xfe   :  { %256 = vrot.lane.b32.xlu0 %v1753_v36, %s1675_s1 }
  0xff   :  { %258 = vrot.lane.b32.xlu1 %v1741_v32, %s1675_s1 }
 0x102   :  { %260 = vrot.lane.b32.xlu0 %v1747_v34, %s1675_s1 }
 0x103   :  { %298 = vrot.lane.b32.xlu1 %v1739_v31, %s1676_s2 }
 0x106   :  { %300 = vrot.lane.b32.xlu0 %v1753_v36, %s1676_s2 }
 0x107   :  { %302 = vrot.lane.b32.xlu1 %v1741_v32, %s1676_s2 }
 0x10a   :  { %304 = vrot.lane.b32.xlu0 %v1747_v34, %s1676_s2 }
 0x10b   :  { %211 = vrot.lane.b32.xlu1 %v1753_v36, %s1674_s0 }
 0x10e   :  { %344 = vrot.lane.b32.xlu0 %v1753_v36, %s1677_s9 }
 0x10f   :  { %342 = vrot.lane.b32.xlu1 %v1739_v31, %s1677_s9 }
 0x112   :  { %348 = vrot.lane.b32.xlu0 %v1747_v34, %s1677_s9 }
 0x113   :  { %346 = vrot.lane.b32.xlu1 %v1741_v32, %s1677_s9 }
 0x168   :  { %v210_v37 = vpop.permute.xlu0 %209 }
 0x169   :  { %v214_v38 = vpop.permute.xlu1 %213 }
 0x16c   :  { %v216_v40 = vpop.permute.xlu0 %215 }
 0x16d   :  { %v255_v41 = vpop.permute.xlu1 %254  ;;  %v223_v52 = vsel %vm219_vm1, %v216_v40, %v210_v37  ;;  %v220_v13 = vsel %vm219_vm1, %v214_v38, %v216_v40 }
 0x16e   :  { %v246_v59 = vadd.f32 %v1788_v49, %v223_v52  ;;  %v249_v25 = vadd.f32 %v1813_v62, %v220_v13 }
 0x170   :  { %v257_v44 = vpop.permute.xlu0 %256  ;;  %v250_v14 = vmax.f32 %v1739_v31, %v246_v59  ;;  %v253_v52 = vmax.f32 %v1747_v34, %v249_v25 }
 0x171   :  { %v259_v46 = vpop.permute.xlu1 %258  ;;  %v265_v15 = vsel %vm262_vm2, %v255_v41, %v257_v44 }
 0x172   :  { %v264_v17 = vsel %vm262_vm2, %v257_v44, %v259_v46  ;;  %v291_v26 = vadd.f32 %v1816_v63, %v265_v15 }
 0x173   :  { %v292_v30 = vadd.f32 %v1819_v0, %v264_v17 }
 0x174   :  { %v261_v48 = vpop.permute.xlu0 %260 }
 0x175   :  { %v299_v50 = vpop.permute.xlu1 %298  ;;  %v266_v60 = vsel %vm262_vm2, %v261_v48, %v255_v41  ;;  %v263_v33 = vsel %vm262_vm2, %v259_v46, %v261_v48 }
 0x176   :  { %v290_v7 = vadd.f32 %v1806_v57, %v266_v60 }
 0x178   :  { %v301_v58 = vpop.permute.xlu0 %300  ;;  %v294_v27 = vmax.f32 %v250_v14, %v290_v7 }
 0x179   :  { %v303_v61 = vpop.permute.xlu1 %302  ;;  %v309_v4 = vsel %vm306_vm3, %v299_v50, %v301_v58 }
 0x17a   :  { %v334_v18 = vadd.f32 %v1822_v1, %v309_v4  ;;  %v308_v39 = vsel %vm306_vm3, %v301_v58, %v303_v61  ;;  %v293_v58 = vadd.f32 %v1825_v2, %v263_v33 }
 0x17b   :  { %v335_v59 = vadd.f32 %v1837_v8, %v308_v39 }
 0x17c   :  { %v305_v11 = vpop.permute.xlu0 %304  ;;  %v338_v40 = vmax.f32 %v294_v27, %v334_v18  ;;  %v297_v17 = vmax.f32 %v253_v52, %v293_v58 }
 0x17d   :  { %v212_v16 = vpop.permute.xlu1 %211  ;;  %v307_v41 = vsel %vm306_vm3, %v303_v61, %v305_v11  ;;  %v310_v46 = vsel %vm306_vm3, %v305_v11, %v299_v50 }
 0x17e   :  { %v221_v19 = vsel %vm219_vm1, %v212_v16, %v214_v38  ;;  %v222_v20 = vsel %vm219_vm1, %v210_v37, %v212_v16  ;;  %v336_v60 = vadd.f32 %v1840_v9, %v307_v41  ;;  %v337_v7 = vadd.f32 %v1843_v10, %v310_v46 }
 0x17f   :  { %v247_v21 = vadd.f32 %v1830_v5, %v222_v20  ;;  %v248_v22 = vadd.f32 %v1833_v6, %v221_v19 }
 0x180   :  { %v345_v28 = vpop.permute.xlu0 %344 }
 0x181   :  { %v251_v35 = vmax.f32 %v1753_v36, %v247_v21  ;;  %v252_v37 = vmax.f32 %v1741_v32, %v248_v22  ;;  %v343_v38 = vpop.permute.xlu1 %342  ;;  %v341_v21 = vmax.f32 %v297_v17, %v337_v7 }
 0x182   :  { %v353_v42 = vsel %vm350_vm4, %v343_v38, %v345_v28 }
 0x183   :  { %v295_v44 = vmax.f32 %v251_v35, %v291_v26  ;;  %v296_v47 = vmax.f32 %v252_v37, %v292_v30  ;;  %v378_v48 = vadd.f32 %v1864_v23, %v353_v42  ;;  %v1581_v37 = vld [vmem:[%s2486_s5 + $0x10] sm:$0xf] }
 0x184   :  { %v349_v56 = vpop.permute.xlu0 %348  ;;  %v1953_v41 = vrot.slane %v1581_v37, %v1794_v53  ;;  %v1956_v42 = vrot.slane %v1581_v37, %v1796_v54  ;;  %v1965_v46 = vrot.slane %v1581_v37, %v1790_v51 }
 0x185   :  { %v1895_v61 = vmax.f32 %v338_v40, %v378_v48  ;;  %v347_v4 = vpop.permute.xlu1 %346  ;;  %v354_v12 = vsel %vm350_vm4, %v349_v56, %v343_v38  ;;  %v340_v13 = vmax.f32 %v296_v47, %v336_v60  ;;  %v339_v14 = vmax.f32 %v295_v44, %v335_v59  ;;  %v1582_v38 = vld [vmem:[%s2486_s5 + $0x14] sm:$0xf]  ;;  %v1583_v47 = vld [vmem:[%s2486_s5 + $0x18] sm:$0xf] }
 0x186   :  { %v352_v50 = vsel %vm350_vm4, %v345_v28, %v347_v4  ;;  %v351_v11 = vsel %vm350_vm4, %v347_v4, %v349_v56  ;;  %v381_v19 = vadd.f32 %v1890_v55, %v354_v12  ;;  %v1959_v44 = vrot.slane %v1581_v37, %v1781_v45 }
 0x187   :  { %v379_v15 = vadd.f32 %v1867_v24, %v352_v50  ;;  %v380_v16 = vadd.f32 %v1872_v29, %v351_v11  ;;  %386 = vrot.lane.b32.xlu1 %v1895_v61, %s1678_s18  ;;  %v1971_v52 = vrot.slane %v1582_v38, %v1794_v53  ;;  %v1976_v58 = vrot.slane %v1582_v38, %v1796_v54 }
 0x188   :  { %v1917_v22 = vmax.f32 %v341_v21, %v381_v19  ;;  %v1979_v59 = vrot.slane %v1582_v38, %v1781_v45  ;;  %v1983_v60 = vrot.slane %v1582_v38, %v1790_v51  ;;  %v1988_v50 = vrot.slane %v1583_v47, %v1781_v45 }
 0x189   :  { %v1908_v18 = vmax.f32 %v339_v14, %v379_v15  ;;  %v1911_v20 = vmax.f32 %v340_v13, %v380_v16  ;;  %v1991_v11 = vrot.slane %v1583_v47, %v1794_v53  ;;  %v1584_v13 = vld [vmem:[%s2486_s5 + $0x1c] sm:$0xf]  ;;  %v2010_v37 = vrot.slane %v1583_v47, %v1790_v51 }
 0x18a   :  { %2496 = vst [vmem:[#allocation2_spill] sm:$0xff] %v1979_v59 }
 0x18b   :  { %388 = vrot.lane.b32.xlu0 %v1908_v18, %s1678_s18  ;;  %390 = vrot.lane.b32.xlu1 %v1911_v20, %s1678_s18  ;;  %2497 = vst [vmem:[#allocation3_spill] sm:$0xff] %v1991_v11 }
 0x18f   :  { %392 = vrot.lane.b32.xlu0 %v1917_v22, %s1678_s18  ;;  %430 = vrot.lane.b32.xlu1 %v1895_v61, %s1679_s19 }
 0x193   :  { %432 = vrot.lane.b32.xlu0 %v1908_v18, %s1679_s19  ;;  %434 = vrot.lane.b32.xlu1 %v1911_v20, %s1679_s19 }
 0x197   :  { %436 = vrot.lane.b32.xlu0 %v1917_v22, %s1679_s19  ;;  %474 = vrot.lane.b32.xlu1 %v1895_v61, %s1680_s20 }
 0x19b   :  { %476 = vrot.lane.b32.xlu0 %v1908_v18, %s1680_s20  ;;  %478 = vrot.lane.b32.xlu1 %v1911_v20, %s1680_s20 }
 0x19f   :  { %480 = vrot.lane.b32.xlu0 %v1917_v22, %s1680_s20  ;;  %518 = vrot.lane.b32.xlu1 %v1895_v61, %s1681_s21 }
 0x1a3   :  { %520 = vrot.lane.b32.xlu0 %v1908_v18, %s1681_s21  ;;  %522 = vrot.lane.b32.xlu1 %v1911_v20, %s1681_s21 }
 0x1a7   :  { %524 = vrot.lane.b32.xlu0 %v1917_v22, %s1681_s21 }
 0x1f9   :  { %v387_v25 = vpop.permute.xlu1 %386 }
 0x1fd   :  { %v391_v26 = vpop.permute.xlu1 %390  ;;  %v389_v27 = vpop.permute.xlu0 %388 }
 0x1fe   :  { %v397_v56 = vsel %vm394_vm5, %v387_v25, %v389_v27  ;;  %v396_v14 = vsel %vm394_vm5, %v389_v27, %v391_v26 }
 0x1ff   :  { %v423_v19 = vadd.f32 %v1953_v41, %v397_v56 }
 0x201   :  { %v431_v28 = vpop.permute.xlu1 %430  ;;  %v393_v30 = vpop.permute.xlu0 %392 }
 0x202   :  { %v398_v48 = vsel %vm394_vm5, %v393_v30, %v387_v25  ;;  %v395_v15 = vsel %vm394_vm5, %v391_v26, %v393_v30  ;;  %v2007_v25 = vrot.slane %v1583_v47, %v1796_v54  ;;  %v424_v30 = vadd.f32 %v1956_v42, %v396_v14 }
 0x203   :  { %v422_v16 = vadd.f32 %v1959_v44, %v398_v48  ;;  %v425_v38 = vadd.f32 %v1965_v46, %v395_v15  ;;  %v427_v14 = vmax.f32 %v1908_v18, %v423_v19 }
 0x205   :  { %v435_v33 = vpop.permute.xlu1 %434  ;;  %v433_v35 = vpop.permute.xlu0 %432  ;;  %v429_v18 = vmax.f32 %v1917_v22, %v425_v38 }
 0x206   :  { %v441_v17 = vsel %vm438_vm6, %v431_v28, %v433_v35  ;;  %v440_v48 = vsel %vm438_vm6, %v433_v35, %v435_v33 }
 0x207   :  { %v467_v47 = vadd.f32 %v1971_v52, %v441_v17  ;;  %v2036_v17 = vrot.slane %v1584_v13, %v1796_v54 }
 0x209   :  { %v475_v39 = vpop.permute.xlu1 %474  ;;  %v437_v40 = vpop.permute.xlu0 %436  ;;  %v471_v19 = vmax.f32 %v427_v14, %v467_v47 }
 0x20a   :  { %v442_v4 = vsel %vm438_vm6, %v437_v40, %v431_v28  ;;  %v2017_v28 = vrot.slane %v1584_v13, %v1781_v45  ;;  %v2029_v45 = vrot.slane %v1584_v13, %v1794_v53  ;;  %v428_v53 = vmax.f32 %v1911_v20, %v424_v30 }
 0x20b   :  { %v466_v27 = vadd.f32 %v1979_v59, %v442_v4  ;;  %v426_v4 = vmax.f32 %v1895_v61, %v422_v16  ;;  %v468_v61 = vadd.f32 %v1976_v58, %v440_v48 }
 0x20d   :  { %v479_v7 = vpop.permute.xlu1 %478  ;;  %v477_v12 = vpop.permute.xlu0 %476  ;;  %v470_v16 = vmax.f32 %v426_v4, %v466_v27 }
 0x20e   :  { %v485_v21 = vsel %vm482_vm7, %v475_v39, %v477_v12  ;;  %v484_v26 = vsel %vm482_vm7, %v477_v12, %v479_v7  ;;  %v439_v12 = vsel %vm438_vm6, %v435_v33, %v437_v40  ;;  %v2042_v40 = vrot.slane %v1584_v13, %v1790_v51 }
 0x20f   :  { %v510_v59 = vadd.f32 %v1988_v50, %v485_v21  ;;  %v511_v15 = vadd.f32 %v1991_v11, %v484_v26  ;;  %v469_v21 = vadd.f32 %v1983_v60, %v439_v12  ;;  %v472_v13 = vmax.f32 %v428_v53, %v468_v61 }
 0x211   :  { %v519_v56 = vpop.permute.xlu1 %518  ;;  %v481_v3 = vpop.permute.xlu0 %480  ;;  %v514_v54 = vmax.f32 %v470_v16, %v510_v59  ;;  %v515_v51 = vmax.f32 %v471_v19, %v511_v15  ;;  %v473_v30 = vmax.f32 %v429_v18, %v469_v21  ;;  %v2498_v16 = vmov 0.0  }
 0x212   :  { %v483_v35 = vsel %vm482_vm7, %v479_v7, %v481_v3  ;;  %v486_v33 = vsel %vm482_vm7, %v481_v3, %v475_v39 }
 0x213   :  { %v512_v11 = vadd.f32 %v2007_v25, %v483_v35  ;;  %v513_v39 = vadd.f32 %v2010_v37, %v486_v33 }
 0x215   :  { %v523_v7 = vpop.permute.xlu1 %522  ;;  %v521_v26 = vpop.permute.xlu0 %520  ;;  %v516_v47 = vmax.f32 %v472_v13, %v512_v11  ;;  %v517_v14 = vmax.f32 %v473_v30, %v513_v39  ;;  %v1585_v11 = vld [vmem:[%s2487_s3 + $0x8] sm:$0xff] }
 0x216   :  { %v528_v27 = vsel %vm526_vm8, %v521_v26, %v523_v7  ;;  %v529_v3 = vsel %vm526_vm8, %v519_v56, %v521_v26 }
 0x217   :  { %v554_v20 = vadd.f32 %v2017_v28, %v529_v3  ;;  %v555_v22 = vadd.f32 %v2029_v45, %v528_v27 }
 0x219   :  { %v2055_v38 = vmax.f32 %v514_v54, %v554_v20  ;;  %v2057_v59 = vmax.f32 %v515_v51, %v555_v22  ;;  %v525_v48 = vpop.permute.xlu0 %524 }
 0x21a   :  { %v527_v4 = vsel %vm526_vm8, %v523_v7, %v525_v48  ;;  %v530_v12 = vsel %vm526_vm8, %v525_v48, %v519_v56 }
 0x21b   :  { %v556_v15 = vadd.f32 %v2036_v17, %v527_v4  ;;  %v557_v35 = vadd.f32 %v2042_v40, %v530_v12  ;;  %880 = vrot.lane.b32.xlu1 %v2055_v38, %s1674_s0  ;;  %882 = vrot.lane.b32.xlu0 %v2057_v59, %s1674_s0 }
 0x21c   :  { %1586 = vmatprep.subr.msk.mxu0 %vm568_vm9, %v2057_v59 }
 0x21d   :  { %v2074_v56 = vmax.f32 %v516_v47, %v556_v15  ;;  %v2076_v61 = vmax.f32 %v517_v14, %v557_v35  ;;  %1587 = vmatpush1.msk.msra.mxu0 %vm568_vm9, %v2055_v38 }
 0x21e   :  { %1592 = vmatprep.subr.msk.mxu0 %vm568_vm9, %v1753_v36  ;;  %1588 = vmatmul.mubr.msk.f32.vlgmr.msra.gmra.mrb[2].mxu0 %vm564_vm10, %v1585_v11 }
 0x21f   :  { %1593 = vmatpush1.msk.msra.mxu0 %vm568_vm9, %v1739_v31  ;;  %886 = vrot.lane.b32.xlu0 %v2076_v61, %s1674_s0 }
 0x220   :  { %1589 = vmatprep.subr.msk.mxu1 %vm568_vm9, %v2076_v61  ;;  %884 = vrot.lane.b32.xlu1 %v2074_v56, %s1674_s0 }
 0x221   :  { %1590 = vmatpush1.msk.msra.mxu1 %vm568_vm9, %v2074_v56  ;;  %802 = vmatprep.mubr.f32.mxu0 %v2498_v16 }
 0x222   :  { %1595 = vmatprep.subr.msk.mxu1 %vm568_vm9, %v1747_v34  ;;  %1591 = vmatmul.mubr.msk.f32.vlgmr.msra.gmra.mrb[2].mxu1 %vm564_vm10, %v1585_v11 }
 0x223   :  { %1596 = vmatpush1.msk.msra.mxu1 %vm568_vm9, %v1741_v32  ;;  %902 = vrot.lane.b32.xlu0 %v2057_v59, %s1675_s1 }
 0x224   :  { %900 = vrot.lane.b32.xlu1 %v2055_v38, %s1675_s1  ;;  %873 = vmatprep.mubr.f32.mxu1 %v2498_v16 }
 0x227   :  { %906 = vrot.lane.b32.xlu0 %v2076_v61, %s1675_s1 }
 0x228   :  { %904 = vrot.lane.b32.xlu1 %v2074_v56, %s1675_s1 }
 0x22b   :  { %922 = vrot.lane.b32.xlu0 %v2057_v59, %s1676_s2 }
 0x22c   :  { %920 = vrot.lane.b32.xlu1 %v2055_v38, %s1676_s2 }
 0x22f   :  { %926 = vrot.lane.b32.xlu0 %v2076_v61, %s1676_s2 }
 0x230   :  { %924 = vrot.lane.b32.xlu1 %v2074_v56, %s1676_s2 }
 0x233   :  { %942 = vrot.lane.b32.xlu0 %v2057_v59, %s1677_s9 }
 0x234   :  { %940 = vrot.lane.b32.xlu1 %v2055_v38, %s1677_s9 }
 0x237   :  { %946 = vrot.lane.b32.xlu0 %v2076_v61, %s1677_s9 }
 0x238   :  { %944 = vrot.lane.b32.xlu1 %v2074_v56, %s1677_s9 }
 0x28d   :  { %v881_v31 = vpop.permute.xlu1 %880  ;;  %v883_v32 = vpop.permute.xlu0 %882 }
 0x28e   :  { %v890_v27 = vsel %vm219_vm1, %v881_v31, %v883_v32 }
 0x28f   :  { %v893_v13 = vadd.f32 %v890_v27, %v1830_v5 }
 0x291   :  { %v887_v34 = vpop.permute.xlu0 %886 }
 0x292   :  { %v885_v36 = vpop.permute.xlu1 %884  ;;  %v891_v21 = vsel %vm219_vm1, %v887_v34, %v881_v31 }
 0x293   :  { %v889_v3 = vsel %vm219_vm1, %v883_v32, %v885_v36  ;;  %v892_v51 = vadd.f32 %v891_v21, %v1788_v49  ;;  %v888_v48 = vsel %vm219_vm1, %v885_v36, %v887_v34 }
 0x294   :  { %v894_v30 = vadd.f32 %v889_v3, %v1833_v6  ;;  %v895_v35 = vadd.f32 %v888_v48, %v1813_v62 }
 0x295   :  { %v903_v33 = vpop.permute.xlu0 %902  ;;  %v896_v4 = vmax.f32 %v2055_v38, %v892_v51  ;;  %v897_v38 = vmax.f32 %v2057_v59, %v893_v13 }
 0x296   :  { %v901_v53 = vpop.permute.xlu1 %900 }
 0x297   :  { %v910_v12 = vsel %vm262_vm2, %v901_v53, %v903_v33 }
 0x298   :  { %v913_v36 = vadd.f32 %v910_v12, %v1816_v63 }
 0x299   :  { %v907_v18 = vpop.permute.xlu0 %906 }
 0x29a   :  { %v905_v19 = vpop.permute.xlu1 %904  ;;  %v911_v26 = vsel %vm262_vm2, %v907_v18, %v901_v53 }
 0x29b   :  { %v912_v20 = vadd.f32 %v911_v26, %v1806_v57  ;;  %v909_v14 = vsel %vm262_vm2, %v903_v33, %v905_v19  ;;  %v898_v33 = vmax.f32 %v2074_v56, %v894_v30  ;;  %v908_v26 = vsel %vm262_vm2, %v905_v19, %v907_v18 }
 0x29c   :  { %v914_v53 = vadd.f32 %v909_v14, %v1819_v0  ;;  %v917_v56 = vmax.f32 %v897_v38, %v913_v36  ;;  %v915_v18 = vadd.f32 %v908_v26, %v1825_v2  ;;  %v208_v36 = vld [vmem:[%s2487_s3] sm:$0xff] }
 0x29d   :  { %v923_v7 = vpop.permute.xlu0 %922  ;;  %v916_v11 = vmax.f32 %v896_v4, %v912_v20  ;;  %v899_v20 = vmax.f32 %v2076_v61, %v895_v35  ;;  %1594 = vmatmul.mubr.msk.f32.vlgmr.msra.gmra.mrb[2].mxu0 %vm564_vm10, %v208_v36  ;;  %1597 = vmatmul.mubr.msk.f32.vlgmr.msra.gmra.mrb[2].mxu1 %vm564_vm10, %v208_v36 }
 0x29e   :  { %v921_v54 = vpop.permute.xlu1 %920  ;;  %v918_v30 = vmax.f32 %v898_v33, %v914_v53  ;;  %1121 = vmatprep.mubr.f32.mxu0 %v2498_v16  ;;  %1192 = vmatprep.mubr.f32.mxu1 %v2498_v16 }
 0x29f   :  { %v930_v39 = vsel %vm306_vm3, %v921_v54, %v923_v7  ;;  %v919_v35 = vmax.f32 %v899_v20, %v915_v18 }
 0x2a0   :  { %v932_v15 = vadd.f32 %v930_v39, %v1822_v1 }
 0x2a1   :  { %v927_v22 = vpop.permute.xlu0 %926 }
 0x2a2   :  { %v925_v47 = vpop.permute.xlu1 %924  ;;  %v936_v27 = vmax.f32 %v916_v11, %v932_v15  ;;  %v931_v51 = vsel %vm306_vm3, %v927_v22, %v921_v54 }
 0x2a3   :  { %v929_v31 = vsel %vm306_vm3, %v923_v7, %v925_v47  ;;  %v928_v32 = vsel %vm306_vm3, %v925_v47, %v927_v22  ;;  %v935_v47 = vadd.f32 %v931_v51, %v1843_v10 }
 0x2a4   :  { %v933_v3 = vadd.f32 %v929_v31, %v1837_v8  ;;  %v934_v59 = vadd.f32 %v928_v32, %v1840_v9 }
 0x2a5   :  { %v943_v34 = vpop.permute.xlu0 %942 }
 0x2a6   :  { %v941_v21 = vpop.permute.xlu1 %940  ;;  %v937_v61 = vmax.f32 %v917_v56, %v933_v3  ;;  %v938_v12 = vmax.f32 %v918_v30, %v934_v59 }
 0x2a7   :  { %v950_v7 = vsel %vm350_vm4, %v941_v21, %v943_v34 }
 0x2a8   :  { %v952_v39 = vadd.f32 %v950_v7, %v1864_v23 }
 0x2a9   :  { %v947_v13 = vpop.permute.xlu0 %946 }
 0x2aa   :  { %v2166_v19 = vmax.f32 %v936_v27, %v952_v39  ;;  %v945_v48 = vpop.permute.xlu1 %944  ;;  %v951_v22 = vsel %vm350_vm4, %v947_v13, %v941_v21 }
 0x2ab   :  { %v949_v4 = vsel %vm350_vm4, %v943_v34, %v945_v48  ;;  %v948_v54 = vsel %vm350_vm4, %v945_v48, %v947_v13  ;;  %v955_v31 = vadd.f32 %v951_v22, %v1890_v55  ;;  %v939_v34 = vmax.f32 %v919_v35, %v935_v47 }
 0x2ac   :  { %v953_v14 = vadd.f32 %v949_v4, %v1867_v24  ;;  %v954_v15 = vadd.f32 %v948_v54, %v1872_v29  ;;  %960 = vrot.lane.b32.xlu1 %v2166_v19, %s1678_s18 }
 0x2ad   :  { %v2188_v38 = vmax.f32 %v939_v34, %v955_v31 }
 0x2ae   :  { %v2179_v11 = vmax.f32 %v937_v61, %v953_v14  ;;  %v2182_v32 = vmax.f32 %v938_v12, %v954_v15  ;;  %v2499_v61 = vld [vmem:[#allocation2_spill] sm:$0xff] }
 0x2b0   :  { %962 = vrot.lane.b32.xlu0 %v2179_v11, %s1678_s18  ;;  %964 = vrot.lane.b32.xlu1 %v2182_v32, %s1678_s18 }
 0x2b4   :  { %966 = vrot.lane.b32.xlu0 %v2188_v38, %s1678_s18  ;;  %980 = vrot.lane.b32.xlu1 %v2166_v19, %s1679_s19 }
 0x2b8   :  { %982 = vrot.lane.b32.xlu0 %v2179_v11, %s1679_s19  ;;  %984 = vrot.lane.b32.xlu1 %v2182_v32, %s1679_s19 }
 0x2bc   :  { %986 = vrot.lane.b32.xlu0 %v2188_v38, %s1679_s19  ;;  %1000 = vrot.lane.b32.xlu1 %v2166_v19, %s1680_s20 }
 0x2c0   :  { %1002 = vrot.lane.b32.xlu0 %v2179_v11, %s1680_s20  ;;  %1004 = vrot.lane.b32.xlu1 %v2182_v32, %s1680_s20 }
 0x2c4   :  { %1006 = vrot.lane.b32.xlu0 %v2188_v38, %s1680_s20  ;;  %1020 = vrot.lane.b32.xlu1 %v2166_v19, %s1681_s21 }
 0x2c8   :  { %1022 = vrot.lane.b32.xlu0 %v2179_v11, %s1681_s21  ;;  %1024 = vrot.lane.b32.xlu1 %v2182_v32, %s1681_s21 }
 0x2cc   :  { %1026 = vrot.lane.b32.xlu0 %v2188_v38, %s1681_s21 }
 0x31e   :  { %v961_v53 = vpop.permute.xlu1 %960 }
 0x322   :  { %v965_v21 = vpop.permute.xlu1 %964  ;;  %v963_v33 = vpop.permute.xlu0 %962 }
 0x323   :  { %v970_v20 = vsel %vm394_vm5, %v961_v53, %v963_v33  ;;  %v969_v18 = vsel %vm394_vm5, %v963_v33, %v965_v21 }
 0x324   :  { %v973_v54 = vadd.f32 %v970_v20, %v1953_v41  ;;  %v974_v15 = vadd.f32 %v969_v18, %v1956_v42 }
 0x326   :  { %v981_v26 = vpop.permute.xlu1 %980  ;;  %v967_v27 = vpop.permute.xlu0 %966 }
 0x327   :  { %v971_v39 = vsel %vm394_vm5, %v967_v27, %v961_v53  ;;  %v968_v48 = vsel %vm394_vm5, %v965_v21, %v967_v27  ;;  %v977_v27 = vmax.f32 %v2179_v11, %v973_v54 }
 0x328   :  { %v972_v47 = vadd.f32 %v971_v39, %v1959_v44  ;;  %v975_v35 = vadd.f32 %v968_v48, %v1965_v46  ;;  %v2500_v39 = vld [vmem:[#allocation3_spill] sm:$0xff] }
 0x32a   :  { %v985_v7 = vpop.permute.xlu1 %984  ;;  %v983_v3 = vpop.permute.xlu0 %982  ;;  %v976_v21 = vmax.f32 %v2166_v19, %v972_v47  ;;  %v978_v19 = vmax.f32 %v2182_v32, %v974_v15  ;;  %v979_v48 = vmax.f32 %v2188_v38, %v975_v35 }
 0x32b   :  { %v990_v4 = vsel %vm438_vm6, %v981_v26, %v983_v3  ;;  %v989_v31 = vsel %vm438_vm6, %v983_v3, %v985_v7 }
 0x32c   :  { %v993_v34 = vadd.f32 %v990_v4, %v1971_v52  ;;  %v994_v3 = vadd.f32 %v989_v31, %v1976_v58 }
 0x32e   :  { %v1001_v51 = vpop.permute.xlu1 %1000  ;;  %v987_v59 = vpop.permute.xlu0 %986 }
 0x32f   :  { %v991_v13 = vsel %vm438_vm6, %v987_v59, %v981_v26  ;;  %v988_v33 = vsel %vm438_vm6, %v985_v7, %v987_v59  ;;  %v997_v7 = vmax.f32 %v977_v27, %v993_v34 }
 0x330   :  { %v992_v12 = vadd.f32 %v991_v13, %v2499_v61  ;;  %v995_v59 = vadd.f32 %v988_v33, %v1983_v60 }
 0x332   :  { %v1005_v56 = vpop.permute.xlu1 %1004  ;;  %v1003_v30 = vpop.permute.xlu0 %1002  ;;  %v999_v15 = vmax.f32 %v979_v48, %v995_v59 }
 0x333   :  { %v1010_v22 = vsel %vm482_vm7, %v1001_v51, %v1003_v30  ;;  %v1009_v14 = vsel %vm482_vm7, %v1003_v30, %v1005_v56  ;;  %v996_v30 = vmax.f32 %v976_v21, %v992_v12 }
 0x334   :  { %v1012_v26 = vadd.f32 %v1010_v22, %v1988_v50  ;;  %v1013_v20 = vadd.f32 %v1009_v14, %v2500_v39  ;;  %v998_v14 = vmax.f32 %v978_v19, %v994_v3 }
 0x336   :  { %v1021_v36 = vpop.permute.xlu1 %1020  ;;  %v1007_v53 = vpop.permute.xlu0 %1006  ;;  %v1016_v4 = vmax.f32 %v996_v30, %v1012_v26  ;;  %v1017_v12 = vmax.f32 %v997_v7, %v1013_v20 }
 0x337   :  { %v1008_v13 = vsel %vm482_vm7, %v1005_v56, %v1007_v53  ;;  %v1011_v18 = vsel %vm482_vm7, %v1007_v53, %v1001_v51 }
 0x338   :  { %v1014_v54 = vadd.f32 %v1008_v13, %v2007_v25  ;;  %v1015_v51 = vadd.f32 %v1011_v18, %v2010_v37 }
 0x33a   :  { %v1025_v47 = vpop.permute.xlu1 %1024  ;;  %v1023_v11 = vpop.permute.xlu0 %1022  ;;  %v1018_v53 = vmax.f32 %v998_v14, %v1014_v54  ;;  %v1019_v26 = vmax.f32 %v999_v15, %v1015_v51 }
 0x33b   :  { %v1029_v56 = vsel %vm526_vm8, %v1023_v11, %v1025_v47  ;;  %v1030_v22 = vsel %vm526_vm8, %v1021_v36, %v1023_v11 }
 0x33c   :  { %v1032_v32 = vadd.f32 %v1030_v22, %v2017_v28  ;;  %v1033_v38 = vadd.f32 %v1029_v56, %v2029_v45 }
 0x33e   :  { %v1036_v35 = vmax.f32 %v1016_v4, %v1032_v32  ;;  %v2269_v31 = vmax.f32 %v1017_v12, %v1033_v38  ;;  %v1027_v34 = vpop.permute.xlu0 %1026 }
 0x33f   :  { %v1028_v21 = vsel %vm526_vm8, %v1025_v47, %v1027_v34  ;;  %v1031_v33 = vsel %vm526_vm8, %v1027_v34, %v1021_v36 }
 0x340   :  { %v1034_v27 = vadd.f32 %v1028_v21, %v2036_v17  ;;  %v1035_v20 = vadd.f32 %v1031_v33, %v2042_v40  ;;  %1203 = vrot.lane.b32.xlu1 %v1036_v35, %s1674_s0  ;;  %1205 = vrot.lane.b32.xlu0 %v2269_v31, %s1674_s0 }
 0x341   :  { %1599 = vmatprep.subr.msk.mxu0 %vm568_vm9, %v2269_v31 }
 0x342   :  { %v2282_v13 = vmax.f32 %v1018_v53, %v1034_v27  ;;  %v2284_v3 = vmax.f32 %v1019_v26, %v1035_v20  ;;  %1600 = vmatpush1.msk.msra.mxu0 %vm568_vm9, %v1036_v35 }
 0x344   :  { %1209 = vrot.lane.b32.xlu0 %v2284_v3, %s1674_s0  ;;  %1602 = vmatprep.subr.msk.mxu1 %vm568_vm9, %v2284_v3 }
 0x345   :  { %1207 = vrot.lane.b32.xlu1 %v2282_v13, %s1674_s0  ;;  %1603 = vmatpush1.msk.msra.mxu1 %vm568_vm9, %v2282_v13 }
 0x348   :  { %1225 = vrot.lane.b32.xlu0 %v2269_v31, %s1675_s1 }
 0x349   :  { %1223 = vrot.lane.b32.xlu1 %v1036_v35, %s1675_s1 }
 0x34c   :  { %1229 = vrot.lane.b32.xlu0 %v2284_v3, %s1675_s1 }
 0x34d   :  { %1227 = vrot.lane.b32.xlu1 %v2282_v13, %s1675_s1 }
 0x350   :  { %1245 = vrot.lane.b32.xlu0 %v2269_v31, %s1676_s2 }
 0x351   :  { %1243 = vrot.lane.b32.xlu1 %v1036_v35, %s1676_s2 }
 0x354   :  { %1249 = vrot.lane.b32.xlu0 %v2284_v3, %s1676_s2 }
 0x355   :  { %1247 = vrot.lane.b32.xlu1 %v2282_v13, %s1676_s2 }
 0x358   :  { %1265 = vrot.lane.b32.xlu0 %v2269_v31, %s1677_s9 }
 0x359   :  { %1263 = vrot.lane.b32.xlu1 %v1036_v35, %s1677_s9 }
 0x35c   :  { %1269 = vrot.lane.b32.xlu0 %v2284_v3, %s1677_s9 }
 0x35d   :  { %1267 = vrot.lane.b32.xlu1 %v2282_v13, %s1677_s9 }
 0x3b2   :  { %v1204_v36 = vpop.permute.xlu1 %1203  ;;  %v1206_v30 = vpop.permute.xlu0 %1205 }
 0x3b3   :  { %v1213_v22 = vsel %vm219_vm1, %v1204_v36, %v1206_v30 }
 0x3b4   :  { %v1216_v15 = vadd.f32 %v1213_v22, %v1830_v5 }
 0x3b6   :  { %v1210_v18 = vpop.permute.xlu0 %1209 }
 0x3b7   :  { %v1208_v19 = vpop.permute.xlu1 %1207  ;;  %v1214_v11 = vsel %vm219_vm1, %v1210_v18, %v1204_v36 }
 0x3b8   :  { %v1212_v12 = vsel %vm219_vm1, %v1206_v30, %v1208_v19  ;;  %v1215_v51 = vadd.f32 %v1214_v11, %v1788_v49  ;;  %v1211_v53 = vsel %vm219_vm1, %v1208_v19, %v1210_v18 }
 0x3b9   :  { %v1217_v34 = vadd.f32 %v1212_v12, %v1833_v6 }
 0x3ba   :  { %v1226_v48 = vpop.permute.xlu0 %1225  ;;  %v1219_v33 = vmax.f32 %v1036_v35, %v1215_v51  ;;  %v1220_v35 = vmax.f32 %v2269_v31, %v1216_v15 }
 0x3bb   :  { %v1224_v7 = vpop.permute.xlu1 %1223 }
 0x3bc   :  { %v1233_v26 = vsel %vm262_vm2, %v1224_v7, %v1226_v48 }
 0x3bd   :  { %v1236_v30 = vadd.f32 %v1233_v26, %v1816_v63 }
 0x3be   :  { %v1230_v59 = vpop.permute.xlu0 %1229 }
 0x3bf   :  { %v1228_v47 = vpop.permute.xlu1 %1227  ;;  %v1234_v54 = vsel %vm262_vm2, %v1230_v59, %v1224_v7 }
 0x3c0   :  { %v1235_v38 = vadd.f32 %v1234_v54, %v1806_v57  ;;  %v1232_v49 = vsel %vm262_vm2, %v1226_v48, %v1228_v47  ;;  %v1218_v57 = vadd.f32 %v1211_v53, %v1813_v62  ;;  %v1221_v48 = vmax.f32 %v2282_v13, %v1217_v34 }
 0x3c1   :  { %v1237_v18 = vadd.f32 %v1232_v49, %v1819_v0  ;;  %v1231_v62 = vsel %vm262_vm2, %v1228_v47, %v1230_v59  ;;  %v1240_v13 = vmax.f32 %v1220_v35, %v1236_v30 }
 0x3c2   :  { %v1246_v4 = vpop.permute.xlu0 %1245  ;;  %v1239_v20 = vmax.f32 %v1219_v33, %v1235_v38  ;;  %v1222_v0 = vmax.f32 %v2284_v3, %v1218_v57  ;;  %v1238_v59 = vadd.f32 %v1231_v62, %v1825_v2 }
 0x3c3   :  { %v1244_v56 = vpop.permute.xlu1 %1243  ;;  %v1241_v22 = vmax.f32 %v1221_v48, %v1237_v18 }
 0x3c4   :  { %v1253_v32 = vsel %vm306_vm3, %v1244_v56, %v1246_v4  ;;  %v1242_v38 = vmax.f32 %v1222_v0, %v1238_v59 }
 0x3c5   :  { %v1255_v27 = vadd.f32 %v1253_v32, %v1822_v1 }
 0x3c6   :  { %v1250_v14 = vpop.permute.xlu0 %1249 }
 0x3c7   :  { %v1248_v21 = vpop.permute.xlu1 %1247  ;;  %v1259_v1 = vmax.f32 %v1239_v20, %v1255_v27 }
 0x3c8   :  { %v1252_v5 = vsel %vm306_vm3, %v1246_v4, %v1248_v21  ;;  %v1251_v6 = vsel %vm306_vm3, %v1248_v21, %v1250_v14  ;;  %v1254_v4 = vsel %vm306_vm3, %v1250_v14, %v1244_v56 }
 0x3c9   :  { %v1256_v11 = vadd.f32 %v1252_v5, %v1837_v8  ;;  %v1257_v31 = vadd.f32 %v1251_v6, %v1840_v9  ;;  %v1258_v51 = vadd.f32 %v1254_v4, %v1843_v10 }
 0x3ca   :  { %v1266_v36 = vpop.permute.xlu0 %1265 }
 0x3cb   :  { %v1264_v19 = vpop.permute.xlu1 %1263  ;;  %v1260_v3 = vmax.f32 %v1240_v13, %v1256_v11  ;;  %v1261_v56 = vmax.f32 %v1241_v22, %v1257_v31  ;;  %v1262_v34 = vmax.f32 %v1242_v38, %v1258_v51 }
 0x3cc   :  { %v1273_v7 = vsel %vm350_vm4, %v1264_v19, %v1266_v36 }
 0x3cd   :  { %v1275_v63 = vadd.f32 %v1273_v7, %v1864_v23 }
 0x3ce   :  { %v1270_v54 = vpop.permute.xlu0 %1269 }
 0x3cf   :  { %v2357_v47 = vmax.f32 %v1259_v1, %v1275_v63  ;;  %v1268_v12 = vpop.permute.xlu1 %1267  ;;  %v1274_v23 = vsel %vm350_vm4, %v1270_v54, %v1264_v19 }
 0x3d0   :  { %v1272_v8 = vsel %vm350_vm4, %v1266_v36, %v1268_v12  ;;  %v1271_v9 = vsel %vm350_vm4, %v1268_v12, %v1270_v54  ;;  %v1278_v14 = vadd.f32 %v1274_v23, %v1890_v55 }
 0x3d1   :  { %v1276_v32 = vadd.f32 %v1272_v8, %v1867_v24  ;;  %v1277_v2 = vadd.f32 %v1271_v9, %v1872_v29  ;;  %1283 = vrot.lane.b32.xlu1 %v2357_v47, %s1678_s18  ;;  %v1598_v24 = vld [vmem:[%s2487_s3 + $0x10] sm:$0xff]  ;;  %v1526_v29 = vld [vmem:[%s2488_s4] sm:$0xff] }
 0x3d2   :  { %v2376_v53 = vmax.f32 %v1262_v34, %v1278_v14  ;;  %1601 = vmatmul.mubr.msk.f32.vlgmr.msra.gmra.mrb[2].mxu0 %vm564_vm10, %v1598_v24  ;;  %1604 = vmatmul.mubr.msk.f32.vlgmr.msra.gmra.mrb[2].mxu1 %vm564_vm10, %v1598_v24 }
 0x3d3   :  { %v1280_v10 = vmax.f32 %v1260_v3, %v1276_v32  ;;  %v2371_v15 = vmax.f32 %v1261_v56, %v1277_v2  ;;  %1444 = vmatprep.mubr.f32.mxu0 %v2498_v16  ;;  %1515 = vmatprep.mubr.f32.mxu1 %v2498_v16 }
 0x3d5   :  { %1285 = vrot.lane.b32.xlu0 %v1280_v10, %s1678_s18  ;;  %1287 = vrot.lane.b32.xlu1 %v2371_v15, %s1678_s18 }
 0x3d9   :  { %1289 = vrot.lane.b32.xlu0 %v2376_v53, %s1678_s18  ;;  %1303 = vrot.lane.b32.xlu1 %v2357_v47, %s1679_s19 }
 0x3dd   :  { %1305 = vrot.lane.b32.xlu0 %v1280_v10, %s1679_s19  ;;  %1307 = vrot.lane.b32.xlu1 %v2371_v15, %s1679_s19 }
 0x3e1   :  { %1309 = vrot.lane.b32.xlu0 %v2376_v53, %s1679_s19  ;;  %1323 = vrot.lane.b32.xlu1 %v2357_v47, %s1680_s20 }
 0x3e5   :  { %1325 = vrot.lane.b32.xlu0 %v1280_v10, %s1680_s20  ;;  %1327 = vrot.lane.b32.xlu1 %v2371_v15, %s1680_s20 }
 0x3e9   :  { %1329 = vrot.lane.b32.xlu0 %v2376_v53, %s1680_s20  ;;  %1343 = vrot.lane.b32.xlu1 %v2357_v47, %s1681_s21 }
 0x3ed   :  { %1345 = vrot.lane.b32.xlu0 %v1280_v10, %s1681_s21  ;;  %1347 = vrot.lane.b32.xlu1 %v2371_v15, %s1681_s21 }
 0x3f1   :  { %1349 = vrot.lane.b32.xlu0 %v2376_v53, %s1681_s21  ;;  %1529 = vperm.xlu1 %1639, %v1526_v29  }
 0x443   :  { %v1284_v55 = vpop.permute.xlu1 %1283 }
 0x447   :  { %v1288_v16 = vpop.permute.xlu1 %1287  ;;  %v1286_v21 = vpop.permute.xlu0 %1285 }
 0x448   :  { %v1293_v5 = vsel %vm394_vm5, %v1284_v55, %v1286_v21  ;;  %v1292_v62 = vsel %vm394_vm5, %v1286_v21, %v1288_v16 }
 0x449   :  { %v1296_v36 = vadd.f32 %v1293_v5, %v1953_v41  ;;  %v1297_v4 = vadd.f32 %v1292_v62, %v1956_v42 }
 0x44b   :  { %v1304_v33 = vpop.permute.xlu1 %1303  ;;  %v1290_v26 = vpop.permute.xlu0 %1289  ;;  %v1300_v31 = vmax.f32 %v1280_v10, %v1296_v36 }
 0x44c   :  { %v1294_v6 = vsel %vm394_vm5, %v1290_v26, %v1284_v55  ;;  %v1291_v1 = vsel %vm394_vm5, %v1288_v16, %v1290_v26 }
 0x44d   :  { %v1295_v35 = vadd.f32 %v1294_v6, %v1959_v44  ;;  %v1298_v63 = vadd.f32 %v1291_v1, %v1965_v46 }
 0x44f   :  { %v1308_v49 = vpop.permute.xlu1 %1307  ;;  %v1306_v27 = vpop.permute.xlu0 %1305  ;;  %v1299_v0 = vmax.f32 %v2357_v47, %v1295_v35  ;;  %v1301_v47 = vmax.f32 %v2371_v15, %v1297_v4  ;;  %v1302_v8 = vmax.f32 %v2376_v53, %v1298_v63 }
 0x450   :  { %v1313_v30 = vsel %vm438_vm6, %v1304_v33, %v1306_v27  ;;  %v1312_v22 = vsel %vm438_vm6, %v1306_v27, %v1308_v49 }
 0x451   :  { %v1316_v44 = vadd.f32 %v1313_v30, %v1971_v52  ;;  %v1317_v9 = vadd.f32 %v1312_v22, %v1976_v58 }
 0x453   :  { %v1324_v57 = vpop.permute.xlu1 %1323  ;;  %v1310_v20 = vpop.permute.xlu0 %1309  ;;  %v1321_v15 = vmax.f32 %v1301_v47, %v1317_v9 }
 0x454   :  { %v1314_v18 = vsel %vm438_vm6, %v1310_v20, %v1304_v33  ;;  %v1311_v59 = vsel %vm438_vm6, %v1308_v49, %v1310_v20 }
 0x455   :  { %v1315_v11 = vadd.f32 %v1314_v18, %v2499_v61  ;;  %v1320_v61 = vmax.f32 %v1300_v31, %v1316_v44  ;;  %v1318_v23 = vadd.f32 %v1311_v59, %v1983_v60 }
 0x457   :  { %v1328_v19 = vpop.permute.xlu1 %1327  ;;  %v1326_v48 = vpop.permute.xlu0 %1325  ;;  %v1319_v51 = vmax.f32 %v1299_v0, %v1315_v11  ;;  %v1322_v60 = vmax.f32 %v1302_v8, %v1318_v23 }
 0x458   :  { %v1332_v7 = vsel %vm482_vm7, %v1326_v48, %v1328_v19  ;;  %v1333_v41 = vsel %vm482_vm7, %v1324_v57, %v1326_v48 }
 0x459   :  { %v1335_v12 = vadd.f32 %v1333_v41, %v1988_v50  ;;  %v1336_v52 = vadd.f32 %v1332_v7, %v2500_v39 }
 0x45b   :  { %v1344_v54 = vpop.permute.xlu1 %1343  ;;  %v1330_v13 = vpop.permute.xlu0 %1329  ;;  %v1339_v56 = vmax.f32 %v1319_v51, %v1335_v12  ;;  %v1340_v39 = vmax.f32 %v1320_v61, %v1336_v52 }
 0x45c   :  { %v1331_v42 = vsel %vm482_vm7, %v1328_v19, %v1330_v13  ;;  %v1334_v46 = vsel %vm482_vm7, %v1330_v13, %v1324_v57 }
 0x45d   :  { %v1337_v38 = vadd.f32 %v1331_v42, %v2007_v25  ;;  %v1338_v10 = vadd.f32 %v1334_v46, %v2010_v37  ;;  %v1605_v25 = vld [vmem:[%s2487_s3 + $0x18] sm:$0xff] }
 0x45f   :  { %v1348_v3 = vpop.permute.xlu1 %1347  ;;  %v1346_v50 = vpop.permute.xlu0 %1345  ;;  %v1341_v37 = vmax.f32 %v1321_v15, %v1337_v38  ;;  %v1342_v16 = vmax.f32 %v1322_v60, %v1338_v10 }
 0x460   :  { %v1352_v32 = vsel %vm526_vm8, %v1346_v50, %v1348_v3  ;;  %v1353_v2 = vsel %vm526_vm8, %v1344_v54, %v1346_v50 }
 0x461   :  { %v1355_v14 = vadd.f32 %v1353_v2, %v2017_v28  ;;  %v1356_v58 = vadd.f32 %v1352_v32, %v2029_v45 }
 0x463   :  { %v1359_v34 = vmax.f32 %v1339_v56, %v1355_v14  ;;  %v1360_v53 = vmax.f32 %v1340_v39, %v1356_v58  ;;  %v1350_v24 = vpop.permute.xlu0 %1349 }
 0x464   :  { %v1351_v29 = vsel %vm526_vm8, %v1348_v3, %v1350_v24  ;;  %v1354_v55 = vsel %vm526_vm8, %v1350_v24, %v1344_v54 }
 0x465   :  { %v1357_v28 = vadd.f32 %v1351_v29, %v2036_v17  ;;  %v1358_v45 = vadd.f32 %v1354_v55, %v2042_v40  ;;  %1606 = vmatprep.subr.msk.mxu0 %vm568_vm9, %v1360_v53 }
 0x466   :  { %1607 = vmatpush1.msk.msra.mxu0 %vm568_vm9, %v1359_v34 }
 0x467   :  { %v1361_v21 = vmax.f32 %v1341_v37, %v1357_v28  ;;  %v1362_v33 = vmax.f32 %v1342_v16, %v1358_v45  ;;  %1608 = vmatmul.mubr.msk.f32.vlgmr.msra.gmra.mrb[2].mxu0 %vm564_vm10, %v1605_v25 }
 0x469   :  { %1609 = vmatprep.subr.msk.mxu1 %vm568_vm9, %v1362_v33 }
 0x46a   :  { %1610 = vmatpush1.msk.msra.mxu1 %vm568_vm9, %v1361_v21 }
 0x46b   :  { %1611 = vmatmul.mubr.msk.f32.vlgmr.msra.gmra.mrb[2].mxu1 %vm564_vm10, %v1605_v25 }
 0x470   :  { %v1530_v43 = vpop.permute.xlu1 %1529 }
 0x53a   :  { %v1446_v26 = vpop.f32.mrb[2].mxu0 }
 0x53b   :  { %v1532_v49 = vadd.f32 %v1530_v43, %v1446_v26  ;;  %v1448_v17 = vpop.f32.mrb[3].mxu0 }
 0x53c   :  { %v1533_v27 = vadd.f32 %v1530_v43, %v1448_v17 }
 0x53d   :  { %v1612_v40 = vmul.f32 -1.442695, %v1532_v49 }
 0x53e   :  { %v1613_v57 = vmul.f32 -1.442695, %v1533_v27  ;;  %v1517_v20 = vpop.f32.mrb[2].mxu1 }
 0x53f   :  { %1656 = vpow2.f32 %v1612_v40  ;;  %v1534_v5 = vadd.f32 %v1530_v43, %v1517_v20  ;;  %v1519_v6 = vpop.f32.mrb[3].mxu1 }
 0x540   :  { %1658 = vpow2.f32 %v1613_v57  ;;  %v1535_v36 = vadd.f32 %v1530_v43, %v1519_v6 }
 0x541   :  { %v1614_v35 = vmul.f32 -1.442695, %v1534_v5 }
 0x542   :  { %v1615_v30 = vmul.f32 -1.442695, %v1535_v36 }
 0x543   :  { %1660 = vpow2.f32 %v1614_v35 }
 0x544   :  { %1662 = vpow2.f32 %v1615_v30 }
 0x549   :  { %v1657_v18 = vpop.eup %1656 }
 0x54a   :  { %v1659_v19 = vpop.eup %1658  ;;  %v1548_v48 = vadd.f32 1.0, %v1657_v18 }
 0x54b   :  { %v1549_v62 = vadd.f32 1.0, %v1659_v19 }
 0x54c   :  { %1664 = vrcp.f32 %v1548_v48 }
 0x54d   :  { %v1661_v1 = vpop.eup %1660  ;;  %1666 = vrcp.f32 %v1549_v62 }
 0x54e   :  { %v1663_v7 = vpop.eup %1662  ;;  %v1550_v41 = vadd.f32 1.0, %v1661_v1 }
 0x54f   :  { %v1551_v44 = vadd.f32 1.0, %v1663_v7 }
 0x550   :  { %1668 = vrcp.f32 %v1550_v41 }
 0x551   :  { %1670 = vrcp.f32 %v1551_v44 }
 0x556   :  { %v1665_v11 = vpop.eup %1664 }
 0x557   :  { %v1667_v4 = vpop.eup %1666  ;;  %v1560_v31 = vmul.f32 %v1665_v11, %v1532_v49 }
 0x558   :  { %v1561_v63 = vmul.f32 %v1667_v4, %v1533_v27 }
 0x559   :  { %1564 = vst [vmem:[%s2489_s6] sm:$0xff] %v1560_v31 }
 0x55a   :  { %v1669_v0 = vpop.eup %1668  ;;  %1565 = vst [vmem:[%s2489_s6 + $0x8] sm:$0xff] %v1561_v63 }
 0x55b   :  { %v1671_v54 = vpop.eup %1670  ;;  %v1562_v13 = vmul.f32 %v1669_v0, %v1534_v5 }
 0x55c   :  { %v1563_v22 = vmul.f32 %v1671_v54, %v1535_v36 }
 0x55d   :  { %1566 = vst [vmem:[%s2489_s6 + $0x10] sm:$0xff] %v1562_v13 }
 0x55e   :  { %1567 = vst [vmem:[%s2489_s6 + $0x18] sm:$0xff] %v1563_v22 }

</bundles_post_ra>
